<compile_context>
chip_gen: v7x
topology: tpu7x:2x2x1
jax: 0.10.0
libtpu: 0.0.40
codegen_flags: <defaults>
</compile_context>

<pallas_src>
import math
import functools

import jax
import jax.numpy as jnp
from jax import lax
from jax.experimental import pallas as pl
from jax.experimental.pallas import tpu as pltpu

_EPS = 1e-6
# MXU operand dtype: bf16 operands + f32 accumulation is the biggest throughput
# lever on v6e/v7x and halves weight HBM/VMEM bytes.  Use jnp.float32 for parity.
MATMUL_DTYPE = jnp.bfloat16
_VMEM_LIMIT = 64 * 1024 * 1024


# ----------------------------- small helpers ---------------------------------


def _cparams(*sems):
    return pltpu.CompilerParams(
        dimension_semantics=tuple(sems), vmem_limit_bytes=_VMEM_LIMIT)


def _mm(a, b):
    """a @ b on the MXU with narrowed operands, f32 accumulation."""
    return jnp.dot(a.astype(MATMUL_DTYPE), b.astype(MATMUL_DTYPE),
                   preferred_element_type=jnp.float32)


def _mm_t(a, b):
    """a @ b.T without materializing a transpose (contract last dims)."""
    return lax.dot_general(a.astype(MATMUL_DTYPE), b.astype(MATMUL_DTYPE),
                           (((1,), (1,)), ((), ())),
                           preferred_element_type=jnp.float32)


def _layernorm(x, a, b, eps):
    # NormLayer: a * (x - mean) / (std + eps) + b ; std unbiased (ddof=1); f32 math.
    d = x.shape[-1]
    mean = jnp.mean(x, axis=-1, keepdims=True)
    var = jnp.sum((x - mean) ** 2, axis=-1, keepdims=True) / (d - 1)
    inv = pl.reciprocal(jnp.sqrt(var) + eps, approx=False)  # one recip per row
    return a * (x - mean) * inv + b


def _attend(q, k, v, mask_i8, scale):
    # q: (T, dk), k/v: (S, dk), mask_i8: (Tm, S) with Tm in {1, T}; f32 softmax.
    s = _mm_t(q, k) * scale
    s = jnp.where(mask_i8 != 0, s, jnp.float32(-1e9))
    s = s - jnp.max(s, axis=-1, keepdims=True)
    p = jnp.exp(s)
    p = p * pl.reciprocal(jnp.sum(p, axis=-1, keepdims=True), approx=True)
    return _mm(p, v)  # (T, dk) f32


def _divisor_tile(n, cap):
    """Largest divisor of n that is <= cap, preferring multiples of 128."""
    if n <= cap:
        return n
    start = cap - cap % 128
    for t in range(start, 0, -128):
        if n % t == 0:
            return t
    for t in range(cap, 0, -1):
        if n % t == 0:
            return t
    return n


# ----------------------------- Pallas kernels --------------------------------


def _self_attn_sublayer_kernel(x_ref, a_ref, b_ref, wq_ref, bq_ref, wk_ref, bk_ref,
                               wv_ref, bv_ref, wo_ref, bo_ref, m_ref, o_ref,
                               *, scale, eps):
    # grid = (batch, head); head axis is a reduction -> accumulate out-proj in o_ref.
    h = pl.program_id(1)
    x = x_ref[0]                                   # (T, D) f32 residual stream

    @pl.when(h == 0)
    def _():                                       # residual + out-proj bias, once
        o_ref[0] = x + bo_ref[...]

    xn = _layernorm(x, a_ref[...], b_ref[...], eps)
    q = _mm(xn, wq_ref[0]) + bq_ref[0]             # (T, dk)
    k = _mm(xn, wk_ref[0]) + bk_ref[0]
    v = _mm(xn, wv_ref[0]) + bv_ref[0]
    attn = _attend(q, k, v, m_ref[0], scale)       # (T, dk)
    o_ref[0] += _mm(attn, wo_ref[0])               # per-head slice of W_o


def _cross_attn_sublayer_kernel(x_ref, mem_ref, a_ref, b_ref, wq_ref, bq_ref,
                                wk_ref, bk_ref, wv_ref, bv_ref, wo_ref, bo_ref,
                                m_ref, o_ref, *, scale, eps):
    h = pl.program_id(1)
    x = x_ref[0]                                   # (T, D) f32

    @pl.when(h == 0)
    def _():
        o_ref[0] = x + bo_ref[...]

    xn = _layernorm(x, a_ref[...], b_ref[...], eps)
    mem = mem_ref[0]                               # (S, D); memory is NOT layer-normed
    q = _mm(xn, wq_ref[0]) + bq_ref[0]
    k = _mm(mem, wk_ref[0]) + bk_ref[0]
    v = _mm(mem, wv_ref[0]) + bv_ref[0]
    attn = _attend(q, k, v, m_ref[0], scale)
    o_ref[0] += _mm(attn, wo_ref[0])


def _ln_ffn_kernel(x_ref, a_ref, b_ref, w1_ref, b1_ref, w2_ref, b2_ref, o_ref, *, eps):
    # o = x + relu(LN(x) @ w1 + b1) @ w2 + b2 ; hidden dim F tiled on grid axis 1.
    f = pl.program_id(1)
    x = x_ref[...]

    @pl.when(f == 0)
    def _():
        o_ref[...] = x + b2_ref[...]               # residual + final bias, once

    xn = _layernorm(x, a_ref[...], b_ref[...], eps)
    hid = jnp.maximum(_mm(xn, w1_ref[...]) + b1_ref[...], 0.0)
    o_ref[...] += _mm(hid, w2_ref[...])


def _layernorm_kernel(x_ref, a_ref, b_ref, o_ref, *, eps):
    o_ref[...] = _layernorm(x_ref[...], a_ref[...], b_ref[...], eps)


# ----------------------------- Pallas wrappers --------------------------------


def pallas_self_attn_sublayer(x, ln_a, ln_b, wq, bq, wk, bk, wv, bv, wo, bo,
                              mask_i8, n_heads, eps=_EPS):
    B, T, D = x.shape
    dk = D // n_heads
    Tm = mask_i8.shape[1]
    scale = 1.0 / math.sqrt(dk)
    head_w = pl.BlockSpec((1, D, dk), lambda b, h: (h, 0, 0))
    head_b = pl.BlockSpec((1, 1, dk), lambda b, h: (h, 0, 0))
    row_d = pl.BlockSpec((1, D), lambda b, h: (0, 0))
    return pl.pallas_call(
        functools.partial(_self_attn_sublayer_kernel, scale=scale, eps=eps),
        out_shape=jax.ShapeDtypeStruct((B, T, D), jnp.float32),
        grid=(B, n_heads),
        in_specs=[
            pl.BlockSpec((1, T, D), lambda b, h: (b, 0, 0)),    # x (residual stream)
            row_d, row_d,                                       # LN a, b
            head_w, head_b,                                     # Wq, bq
            head_w, head_b,                                     # Wk, bk
            head_w, head_b,                                     # Wv, bv
            pl.BlockSpec((1, dk, D), lambda b, h: (h, 0, 0)),   # Wo rows for head h
            row_d,                                              # bo
            pl.BlockSpec((1, Tm, T), lambda b, h: (b, 0, 0)),   # mask (int8)
        ],
        out_specs=pl.BlockSpec((1, T, D), lambda b, h: (b, 0, 0)),
        compiler_params=_cparams("parallel", "arbitrary"),
    )(x, ln_a, ln_b, wq, bq, wk, bk, wv, bv, wo, bo, mask_i8)


def pallas_cross_attn_sublayer(x, memory, ln_a, ln_b, wq, bq, wk, bk, wv, bv, wo, bo,
                               mask_i8, n_heads, eps=_EPS):
    B, T, D = x.shape
    S = memory.shape[1]
    dk = D // n_heads
    Tm = mask_i8.shape[1]
    scale = 1.0 / math.sqrt(dk)
    head_w = pl.BlockSpec((1, D, dk), lambda b, h: (h, 0, 0))
    head_b = pl.BlockSpec((1, 1, dk), lambda b, h: (h, 0, 0))
    row_d = pl.BlockSpec((1, D), lambda b, h: (0, 0))
    return pl.pallas_call(
        functools.partial(_cross_attn_sublayer_kernel, scale=scale, eps=eps),
        out_shape=jax.ShapeDtypeStruct((B, T, D), jnp.float32),
        grid=(B, n_heads),
        in_specs=[
            pl.BlockSpec((1, T, D), lambda b, h: (b, 0, 0)),    # x
            pl.BlockSpec((1, S, D), lambda b, h: (b, 0, 0)),    # memory
            row_d, row_d,                                       # LN a, b
            head_w, head_b,                                     # Wq, bq
            head_w, head_b,                                     # Wk, bk
            head_w, head_b,                                     # Wv, bv
            pl.BlockSpec((1, dk, D), lambda b, h: (h, 0, 0)),   # Wo rows for head h
            row_d,                                              # bo
            pl.BlockSpec((1, Tm, S), lambda b, h: (b, 0, 0)),   # mask (int8)
        ],
        out_specs=pl.BlockSpec((1, T, D), lambda b, h: (b, 0, 0)),
        compiler_params=_cparams("parallel", "arbitrary"),
    )(x, memory, ln_a, ln_b, wq, bq, wk, bk, wv, bv, wo, bo, mask_i8)


def pallas_ln_ffn(x2d, a, b, w1, b1, w2, b2, eps=_EPS):
    M, D = x2d.shape
    F = w1.shape[1]
    tm = min(M, 256)
    tf = _divisor_tile(F, 2048)
    return pl.pallas_call(
        functools.partial(_ln_ffn_kernel, eps=eps),
        out_shape=jax.ShapeDtypeStruct((M, D), jnp.float32),
        grid=(pl.cdiv(M, tm), F // tf),
        in_specs=[
            pl.BlockSpec((tm, D), lambda i, f: (i, 0)),
            pl.BlockSpec((1, D), lambda i, f: (0, 0)),
            pl.BlockSpec((1, D), lambda i, f: (0, 0)),
            pl.BlockSpec((D, tf), lambda i, f: (0, f)),
            pl.BlockSpec((1, tf), lambda i, f: (0, f)),
            pl.BlockSpec((tf, D), lambda i, f: (f, 0)),
            pl.BlockSpec((1, D), lambda i, f: (0, 0)),
        ],
        out_specs=pl.BlockSpec((tm, D), lambda i, f: (i, 0)),
        compiler_params=_cparams("parallel", "arbitrary"),
    )(x2d, a, b, w1, b1, w2, b2)


def pallas_layernorm(x2d, a, b, eps=_EPS):
    M, D = x2d.shape
    tm = min(M, 512)
    return pl.pallas_call(
        functools.partial(_layernorm_kernel, eps=eps),
        out_shape=jax.ShapeDtypeStruct((M, D), jnp.float32),
        grid=(pl.cdiv(M, tm),),
        in_specs=[
            pl.BlockSpec((tm, D), lambda i: (i, 0)),
            pl.BlockSpec((1, D), lambda i: (0, 0)),
            pl.BlockSpec((1, D), lambda i: (0, 0)),
        ],
        out_specs=pl.BlockSpec((tm, D), lambda i: (i, 0)),
        compiler_params=_cparams("parallel"),
    )(x2d, a, b)


# ----------------------------- Model (glue in JAX) ----------------------------


def decoder_layer(p, x, memory, src_mask_i8, tgt_mask_i8, n_heads):
    B, T, D = x.shape
    # sublayer 0: pre-norm self-attention, fully fused (LN+QKV+attn+Wo+residual)
    x = pallas_self_attn_sublayer(
        x, p["ln0_a"], p["ln0_b"],
        p["self_wq"], p["self_bq"], p["self_wk"], p["self_bk"],
        p["self_wv"], p["self_bv"], p["self_wo"], p["self_bo"],
        tgt_mask_i8, n_heads)
    # sublayer 1: pre-norm source attention over memory, fully fused
    x = pallas_cross_attn_sublayer(
        x, memory, p["ln1_a"], p["ln1_b"],
        p["src_wq"], p["src_bq"], p["src_wk"], p["src_bk"],
        p["src_wv"], p["src_bv"], p["src_wo"], p["src_bo"],
        src_mask_i8, n_heads)
    # sublayer 2: pre-norm position-wise FFN + residual, F-tiled in one kernel
    x2d = pallas_ln_ffn(x.reshape(B * T, D), p["ln2_a"], p["ln2_b"],
                        p["w1"], p["b1"], p["w2"], p["b2"])
    return x2d.reshape(B, T, D)


def decoder_forward(params, x, memory, src_mask, tgt_mask, n_heads):
    # Masks travel as int8 (no f32 mask DMA, no per-head replication).
    src_i8 = (src_mask != 0).astype(jnp.int8)
    tgt_i8 = (tgt_mask != 0).astype(jnp.int8)
    for lp in params["layers"]:
        x = decoder_layer(lp, x, memory, src_i8, tgt_i8, n_heads)
    B, T, D = x.shape
    return pallas_layernorm(
        x.reshape(B * T, D), params["norm_a"], params["norm_b"]).reshape(B, T, D)


# ----------------------------- Parameter init ---------------------------------


def _linear_params(key, d_in, d_out):
    kw, kb = jax.random.split(key)
    w = jax.random.normal(kw, (d_in, d_out), jnp.float32) * 0.02
    b = jax.random.normal(kb, (d_out,), jnp.float32) * 0.02
    return w, b


def _head_in(w, H):     # (D, D) -> (H, D, dk): input-proj columns split per head
    D, Do = w.shape
    dk = Do // H
    return jnp.transpose(w.reshape(D, H, dk), (1, 0, 2)).astype(MATMUL_DTYPE)


def _head_in_bias(b, H):  # (D,) -> (H, 1, dk)   (kept f32)
    dk = b.shape[0] // H
    return b.reshape(H, 1, dk)


def _head_out(w, H):    # (D, D) -> (H, dk, D): out-proj rows split per head
    Din, D = w.shape
    dk = Din // H
    return w.reshape(H, dk, D).astype(MATMUL_DTYPE)


def init_decoder_params(key, n_layers, d_model, d_ff, n_heads):
    layers = []
    for _ in range(n_layers):
        key, k0, k1, k2, k3, k4, k5, k6, k7, kf1, kf2 = jax.random.split(key, 11)
        wq, bq = _linear_params(k0, d_model, d_model)
        wk, bk = _linear_params(k1, d_model, d_model)
        wv, bv = _linear_params(k2, d_model, d_model)
        swo, sbo = _linear_params(k3, d_model, d_model)
        cwq, cbq = _linear_params(k4, d_model, d_model)
        cwk, cbk = _linear_params(k5, d_model, d_model)
        cwv, cbv = _linear_params(k6, d_model, d_model)
        cwo, cbo = _linear_params(k7, d_model, d_model)
        w1, b1 = _linear_params(kf1, d_model, d_ff)
        w2, b2 = _linear_params(kf2, d_ff, d_model)
        layers.append({
            "self_wq": _head_in(wq, n_heads), "self_bq": _head_in_bias(bq, n_heads),
            "self_wk": _head_in(wk, n_heads), "self_bk": _head_in_bias(bk, n_heads),
            "self_wv": _head_in(wv, n_heads), "self_bv": _head_in_bias(bv, n_heads),
            "self_wo": _head_out(swo, n_heads), "self_bo": sbo.reshape(1, d_model),
            "src_wq": _head_in(cwq, n_heads), "src_bq": _head_in_bias(cbq, n_heads),
            "src_wk": _head_in(cwk, n_heads), "src_bk": _head_in_bias(cbk, n_heads),
            "src_wv": _head_in(cwv, n_heads), "src_bv": _head_in_bias(cbv, n_heads),
            "src_wo": _head_out(cwo, n_heads), "src_bo": cbo.reshape(1, d_model),
            "w1": w1.astype(MATMUL_DTYPE), "b1": b1.reshape(1, d_ff),
            "w2": w2.astype(MATMUL_DTYPE), "b2": b2.reshape(1, d_model),
            "ln0_a": jnp.ones((1, d_model), jnp.float32),
            "ln0_b": jnp.zeros((1, d_model), jnp.float32),
            "ln1_a": jnp.ones((1, d_model), jnp.float32),
            "ln1_b": jnp.zeros((1, d_model), jnp.float32),
            "ln2_a": jnp.ones((1, d_model), jnp.float32),
            "ln2_b": jnp.zeros((1, d_model), jnp.float32),
        })
    return {
        "layers": layers,
        "norm_a": jnp.ones((1, d_model), jnp.float32),
        "norm_b": jnp.zeros((1, d_model), jnp.float32),
    }


# ----------------------------- Main --------------------------------------------

if __name__ == "__main__":
    B, T_TGT, T_SRC = 2, 8, 8
    D_MODEL, N_HEADS, D_FF, N_LAYERS = 32, 4, 64, 2

    key = jax.random.PRNGKey(0)
    key, kx, km, kp = jax.random.split(key, 4)

    x = jax.random.normal(kx, (B, T_TGT, D_MODEL), jnp.float32)
    memory = jax.random.normal(km, (B, T_SRC, D_MODEL), jnp.float32)
    # src_mask: (B, 1, S) all ones; tgt_mask: (B, T, T) causal — passed at natural
    # shape, converted to int8, broadcast in-kernel (no per-head / f32 copies).
    src_mask = jnp.ones((B, 1, T_SRC), jnp.float32)
    tgt_mask = jnp.broadcast_to(
        jnp.tril(jnp.ones((T_TGT, T_TGT), jnp.float32))[None], (B, T_TGT, T_TGT))

    params = init_decoder_params(kp, N_LAYERS, D_MODEL, D_FF, N_HEADS)

    out = decoder_forward(params, x, memory, src_mask, tgt_mask, N_HEADS)
    out = jax.block_until_ready(out)
    assert out.shape == (B, T_TGT, D_MODEL)
    assert bool(jnp.all(jnp.isfinite(out)))
    print("KERNEL_OK")
</pallas_src>

<mosaic_0001>
module attributes {stable_mosaic.version = 11 : i64} {
  func.func @_self_attn_sublayer_kernel(%arg0: i32, %arg1: i32, %arg2: memref<1x8x32xf32, #tpu.memory_space<vmem>>, %arg3: memref<1x32xf32, #tpu.memory_space<vmem>>, %arg4: memref<1x32xf32, #tpu.memory_space<vmem>>, %arg5: memref<1x32x8xbf16, #tpu.memory_space<vmem>>, %arg6: memref<1x1x8xf32, #tpu.memory_space<vmem>>, %arg7: memref<1x32x8xbf16, #tpu.memory_space<vmem>>, %arg8: memref<1x1x8xf32, #tpu.memory_space<vmem>>, %arg9: memref<1x32x8xbf16, #tpu.memory_space<vmem>>, %arg10: memref<1x1x8xf32, #tpu.memory_space<vmem>>, %arg11: memref<1x8x32xbf16, #tpu.memory_space<vmem>>, %arg12: memref<1x32xf32, #tpu.memory_space<vmem>>, %arg13: memref<1x8x8xi8, #tpu.memory_space<vmem>>, %arg14: memref<1x8x32xf32, #tpu.memory_space<vmem>>) attributes {dimension_semantics = [#tpu.dimension_semantics<parallel>, #tpu.dimension_semantics<arbitrary>], iteration_bounds = array<i64: 2, 4>, scalar_prefetch = 0 : i64, scratch_operands = 0 : i64, tpu.core_type = #tpu.core_type<tc>, window_params = [{transform_indices = @transform_0, window_bounds = array<i64: 1, 8, 32>}, {pipeline_mode = #tpu.pipeline_mode<synchronous>, transform_indices = @transform_1, window_bounds = array<i64: 1, 32>}, {pipeline_mode = #tpu.pipeline_mode<synchronous>, transform_indices = @transform_2, window_bounds = array<i64: 1, 32>}, {transform_indices = @transform_3, window_bounds = array<i64: 1, 32, 8>}, {transform_indices = @transform_4, window_bounds = array<i64: 1, 1, 8>}, {transform_indices = @transform_5, window_bounds = array<i64: 1, 32, 8>}, {transform_indices = @transform_6, window_bounds = array<i64: 1, 1, 8>}, {transform_indices = @transform_7, window_bounds = array<i64: 1, 32, 8>}, {transform_indices = @transform_8, window_bounds = array<i64: 1, 1, 8>}, {transform_indices = @transform_9, window_bounds = array<i64: 1, 8, 32>}, {pipeline_mode = #tpu.pipeline_mode<synchronous>, transform_indices = @transform_10, window_bounds = array<i64: 1, 32>}, {transform_indices = @transform_11, window_bounds = array<i64: 1, 8, 8>}, {transform_indices = @transform_12, window_bounds = array<i64: 1, 8, 32>}]} {
    %c0 = arith.constant 0 : index
    %c0_0 = arith.constant 0 : index
    %c0_1 = arith.constant 0 : index
    %0 = vector.load %arg2[%c0, %c0_0, %c0_1] : memref<1x8x32xf32, #tpu.memory_space<vmem>>, vector<1x8x32xf32>
    %1 = vector.shape_cast %0 : vector<1x8x32xf32> to vector<8x32xf32>
    %c0_i32 = arith.constant 0 : i32
    %2 = arith.cmpi eq, %arg1, %c0_i32 : i32
    %3 = arith.extui %2 : i1 to i32
    %c0_i32_2 = arith.constant 0 : i32
    %4 = arith.cmpi ne, %3, %c0_i32_2 : i32
    scf.if %4 {
      %c0_51 = arith.constant 0 : index
      %c0_52 = arith.constant 0 : index
      %88 = vector.load %arg12[%c0_51, %c0_52] : memref<1x32xf32, #tpu.memory_space<vmem>>, vector<1x32xf32>
      %89 = vector.broadcast %88 : vector<1x32xf32> to vector<8x32xf32>
      %90 = arith.addf %1, %89 : vector<8x32xf32>
      %c0_53 = arith.constant 0 : index
      %c0_54 = arith.constant 0 : index
      %c0_55 = arith.constant 0 : index
      %91 = vector.load %arg14[%c0_53, %c0_54, %c0_55] : memref<1x8x32xf32, #tpu.memory_space<vmem>>, vector<1x8x32xf32>
      %92 = vector.shape_cast %91 : vector<1x8x32xf32> to vector<8x32xf32>
      %93 = vector.shape_cast %90 : vector<8x32xf32> to vector<1x8x32xf32>
      tpu.vector_store %arg14[%c0_53, %c0_54, %c0_55], %93 {strides = array<i32>} : memref<1x8x32xf32, #tpu.memory_space<vmem>>, vector<1x8x32xf32>,
    } else {
    }
    %c0_3 = arith.constant 0 : index
    %c0_4 = arith.constant 0 : index
    %5 = vector.load %arg3[%c0_3, %c0_4] : memref<1x32xf32, #tpu.memory_space<vmem>>, vector<1x32xf32>
    %c0_5 = arith.constant 0 : index
    %c0_6 = arith.constant 0 : index
    %6 = vector.load %arg4[%c0_5, %c0_6] : memref<1x32xf32, #tpu.memory_space<vmem>>, vector<1x32xf32>
    %cst = arith.constant dense<0.000000e+00> : vector<8xf32>
    %7 = vector.multi_reduction <add>, %1, %cst [1] : vector<8x32xf32> to vector<8xf32>
    %8 = vector.shape_cast %7 : vector<8xf32> to vector<8x1xf32>
    %cst_7 = arith.constant 3.200000e+01 : f32
    %9 = vector.broadcast %cst_7 : f32 to vector<8x1xf32>
    %10 = arith.divf %8, %9 : vector<8x1xf32>
    %11 = vector.broadcast %10 : vector<8x1xf32> to vector<8x32xf32>
    %12 = arith.subf %1, %11 : vector<8x32xf32>
    %13 = arith.mulf %12, %12 : vector<8x32xf32>
    %cst_8 = arith.constant dense<0.000000e+00> : vector<8xf32>
    %14 = vector.multi_reduction <add>, %13, %cst_8 [1] : vector<8x32xf32> to vector<8xf32>
    %15 = vector.shape_cast %14 : vector<8xf32> to vector<8x1xf32>
    %cst_9 = arith.constant 3.100000e+01 : f32
    %16 = vector.broadcast %cst_9 : f32 to vector<8x1xf32>
    %17 = arith.divf %15, %16 : vector<8x1xf32>
    %18 = math.sqrt %17 : vector<8x1xf32>
    %cst_10 = arith.constant 9.99999997E-7 : f32
    %19 = vector.broadcast %cst_10 : f32 to vector<8x1xf32>
    %20 = arith.addf %18, %19 : vector<8x1xf32>
    %21 = tpu.reciprocal %20 : vector<8x1xf32> -> vector<8x1xf32>
    %22 = vector.broadcast %10 : vector<8x1xf32> to vector<8x32xf32>
    %23 = arith.subf %1, %22 : vector<8x32xf32>
    %24 = vector.broadcast %5 : vector<1x32xf32> to vector<8x32xf32>
    %25 = arith.mulf %24, %23 : vector<8x32xf32>
    %26 = vector.broadcast %21 : vector<8x1xf32> to vector<8x32xf32>
    %27 = arith.mulf %25, %26 : vector<8x32xf32>
    %28 = vector.broadcast %6 : vector<1x32xf32> to vector<8x32xf32>
    %29 = arith.addf %27, %28 : vector<8x32xf32>
    %c0_11 = arith.constant 0 : index
    %c0_12 = arith.constant 0 : index
    %c0_13 = arith.constant 0 : index
    %30 = vector.load %arg5[%c0_11, %c0_12, %c0_13] : memref<1x32x8xbf16, #tpu.memory_space<vmem>>, vector<1x32x8xbf16>
    %31 = vector.shape_cast %30 : vector<1x32x8xbf16> to vector<32x8xbf16>
    %32 = arith.truncf %29 : vector<8x32xf32> to vector<8x32xbf16>
    %cst_14 = arith.constant dense<0.000000e+00> : vector<8x8xf32>
    %33 = tpu.matmul %32, %31, %cst_14 {dimension_numbers = #tpu.dot_dimension_numbers<[1], [0], [0], [1], [0, 0, 1, 1], [], []>} : vector<8x32xbf16>, vector<32x8xbf16>, vector<8x8xf32> -> vector<8x8xf32>
    %c0_15 = arith.constant 0 : index
    %c0_16 = arith.constant 0 : index
    %c0_17 = arith.constant 0 : index
    %34 = vector.load %arg6[%c0_15, %c0_16, %c0_17] : memref<1x1x8xf32, #tpu.memory_space<vmem>>, vector<1x1x8xf32>
    %35 = vector.shape_cast %34 : vector<1x1x8xf32> to vector<1x8xf32>
    %36 = vector.broadcast %35 : vector<1x8xf32> to vector<8x8xf32>
    %37 = arith.addf %33, %36 : vector<8x8xf32>
    %c0_18 = arith.constant 0 : index
    %c0_19 = arith.constant 0 : index
    %c0_20 = arith.constant 0 : index
    %38 = vector.load %arg7[%c0_18, %c0_19, %c0_20] : memref<1x32x8xbf16, #tpu.memory_space<vmem>>, vector<1x32x8xbf16>
    %39 = vector.shape_cast %38 : vector<1x32x8xbf16> to vector<32x8xbf16>
    %40 = arith.truncf %29 : vector<8x32xf32> to vector<8x32xbf16>
    %cst_21 = arith.constant dense<0.000000e+00> : vector<8x8xf32>
    %41 = tpu.matmul %40, %39, %cst_21 {dimension_numbers = #tpu.dot_dimension_numbers<[1], [0], [0], [1], [0, 0, 1, 1], [], []>} : vector<8x32xbf16>, vector<32x8xbf16>, vector<8x8xf32> -> vector<8x8xf32>
    %c0_22 = arith.constant 0 : index
    %c0_23 = arith.constant 0 : index
    %c0_24 = arith.constant 0 : index
    %42 = vector.load %arg8[%c0_22, %c0_23, %c0_24] : memref<1x1x8xf32, #tpu.memory_space<vmem>>, vector<1x1x8xf32>
    %43 = vector.shape_cast %42 : vector<1x1x8xf32> to vector<1x8xf32>
    %44 = vector.broadcast %43 : vector<1x8xf32> to vector<8x8xf32>
    %45 = arith.addf %41, %44 : vector<8x8xf32>
    %c0_25 = arith.constant 0 : index
    %c0_26 = arith.constant 0 : index
    %c0_27 = arith.constant 0 : index
    %46 = vector.load %arg9[%c0_25, %c0_26, %c0_27] : memref<1x32x8xbf16, #tpu.memory_space<vmem>>, vector<1x32x8xbf16>
    %47 = vector.shape_cast %46 : vector<1x32x8xbf16> to vector<32x8xbf16>
    %48 = arith.truncf %29 : vector<8x32xf32> to vector<8x32xbf16>
    %cst_28 = arith.constant dense<0.000000e+00> : vector<8x8xf32>
    %49 = tpu.matmul %48, %47, %cst_28 {dimension_numbers = #tpu.dot_dimension_numbers<[1], [0], [0], [1], [0, 0, 1, 1], [], []>} : vector<8x32xbf16>, vector<32x8xbf16>, vector<8x8xf32> -> vector<8x8xf32>
    %c0_29 = arith.constant 0 : index
    %c0_30 = arith.constant 0 : index
    %c0_31 = arith.constant 0 : index
    %50 = vector.load %arg10[%c0_29, %c0_30, %c0_31] : memref<1x1x8xf32, #tpu.memory_space<vmem>>, vector<1x1x8xf32>
    %51 = vector.shape_cast %50 : vector<1x1x8xf32> to vector<1x8xf32>
    %52 = vector.broadcast %51 : vector<1x8xf32> to vector<8x8xf32>
    %53 = arith.addf %49, %52 : vector<8x8xf32>
    %c0_32 = arith.constant 0 : index
    %c0_33 = arith.constant 0 : index
    %c0_34 = arith.constant 0 : index
    %54 = vector.load %arg13[%c0_32, %c0_33, %c0_34] : memref<1x8x8xi8, #tpu.memory_space<vmem>>, vector<1x8x8xi8>
    %55 = vector.shape_cast %54 : vector<1x8x8xi8> to vector<8x8xi8>
    %56 = arith.truncf %37 : vector<8x8xf32> to vector<8x8xbf16>
    %57 = arith.truncf %45 : vector<8x8xf32> to vector<8x8xbf16>
    %cst_35 = arith.constant dense<0.000000e+00> : vector<8x8xf32>
    %58 = tpu.matmul %56, %57, %cst_35 {dimension_numbers = #tpu.dot_dimension_numbers<[1], [1], [0], [0], [0, 0, 1, 0], [], []>} : vector<8x8xbf16>, vector<8x8xbf16>, vector<8x8xf32> -> vector<8x8xf32>
    %cst_36 = arith.constant 0.353553385 : f32
    %59 = vector.broadcast %cst_36 : f32 to vector<8x8xf32>
    %60 = arith.mulf %58, %59 : vector<8x8xf32>
    %c0_i8 = arith.constant 0 : i8
    %61 = vector.broadcast %c0_i8 : i8 to vector<8x8xi8>
    %62 = arith.cmpi ne, %55, %61 : vector<8x8xi8>
    %cst_37 = arith.constant -1.000000e+09 : f32
    %63 = vector.broadcast %cst_37 : f32 to vector<8x8xf32>
    %64 = arith.select %62, %60, %63 : vector<8x8xi1>, vector<8x8xf32>
    %cst_38 = arith.constant dense<0xFF800000> : vector<8xf32>
    %65 = vector.multi_reduction <maximumf>, %64, %cst_38 [1] : vector<8x8xf32> to vector<8xf32>
    %66 = vector.shape_cast %65 : vector<8xf32> to vector<8x1xf32>
    %67 = vector.broadcast %66 : vector<8x1xf32> to vector<8x8xf32>
    %68 = arith.subf %64, %67 : vector<8x8xf32>
    %69 = math.exp %68 : vector<8x8xf32>
    %cst_39 = arith.constant dense<0.000000e+00> : vector<8xf32>
    %70 = vector.multi_reduction <add>, %69, %cst_39 [1] : vector<8x8xf32> to vector<8xf32>
    %71 = vector.shape_cast %70 : vector<8xf32> to vector<8x1xf32>
    %72 = tpu.reciprocal %71 {approx = true} : vector<8x1xf32> -> vector<8x1xf32>
    %73 = vector.broadcast %72 : vector<8x1xf32> to vector<8x8xf32>
    %74 = arith.mulf %69, %73 : vector<8x8xf32>
    %75 = arith.truncf %74 : vector<8x8xf32> to vector<8x8xbf16>
    %76 = arith.truncf %53 : vector<8x8xf32> to vector<8x8xbf16>
    %cst_40 = arith.constant dense<0.000000e+00> : vector<8x8xf32>
    %77 = tpu.matmul %75, %76, %cst_40 {dimension_numbers = #tpu.dot_dimension_numbers<[1], [0], [0], [1], [0, 0, 1, 1], [], []>} : vector<8x8xbf16>, vector<8x8xbf16>, vector<8x8xf32> -> vector<8x8xf32>
    %c0_41 = arith.constant 0 : index
    %c0_42 = arith.constant 0 : index
    %c0_43 = arith.constant 0 : index
    %78 = vector.load %arg14[%c0_41, %c0_42, %c0_43] : memref<1x8x32xf32, #tpu.memory_space<vmem>>, vector<1x8x32xf32>
    %79 = vector.shape_cast %78 : vector<1x8x32xf32> to vector<8x32xf32>
    %c0_44 = arith.constant 0 : index
    %c0_45 = arith.constant 0 : index
    %c0_46 = arith.constant 0 : index
    %80 = vector.load %arg11[%c0_44, %c0_45, %c0_46] : memref<1x8x32xbf16, #tpu.memory_space<vmem>>, vector<1x8x32xbf16>
    %81 = vector.shape_cast %80 : vector<1x8x32xbf16> to vector<8x32xbf16>
    %82 = arith.truncf %77 : vector<8x8xf32> to vector<8x8xbf16>
    %cst_47 = arith.constant dense<0.000000e+00> : vector<8x32xf32>
    %83 = tpu.matmul %82, %81, %cst_47 {dimension_numbers = #tpu.dot_dimension_numbers<[1], [0], [0], [1], [0, 0, 1, 1], [], []>} : vector<8x8xbf16>, vector<8x32xbf16>, vector<8x32xf32> -> vector<8x32xf32>
    %84 = arith.addf %79, %83 : vector<8x32xf32>
    %c0_48 = arith.constant 0 : index
    %c0_49 = arith.constant 0 : index
    %c0_50 = arith.constant 0 : index
    %85 = vector.load %arg14[%c0_48, %c0_49, %c0_50] : memref<1x8x32xf32, #tpu.memory_space<vmem>>, vector<1x8x32xf32>
    %86 = vector.shape_cast %85 : vector<1x8x32xf32> to vector<8x32xf32>
    %87 = vector.shape_cast %84 : vector<8x32xf32> to vector<1x8x32xf32>
    tpu.vector_store %arg14[%c0_48, %c0_49, %c0_50], %87 {strides = array<i32>} : memref<1x8x32xf32, #tpu.memory_space<vmem>>, vector<1x8x32xf32>,
    return
  }
  func.func @transform_0(%arg0: i32, %arg1: i32) -> (i32, i32, i32) {
    %c0_i32 = arith.constant 0 : i32
    %c0_i32_0 = arith.constant 0 : i32
    %c0_i32_1 = arith.constant 0 : i32
    return %arg0, %c0_i32, %c0_i32_0 : i32, i32, i32
  }
  func.func @transform_1(%arg0: i32, %arg1: i32) -> (i32, i32) {
    %c0_i32 = arith.constant 0 : i32
    %c0_i32_0 = arith.constant 0 : i32
    %c0_i32_1 = arith.constant 0 : i32
    return %c0_i32, %c0_i32_0 : i32, i32
  }
  func.func @transform_2(%arg0: i32, %arg1: i32) -> (i32, i32) {
    %c0_i32 = arith.constant 0 : i32
    %c0_i32_0 = arith.constant 0 : i32
    %c0_i32_1 = arith.constant 0 : i32
    return %c0_i32, %c0_i32_0 : i32, i32
  }
  func.func @transform_3(%arg0: i32, %arg1: i32) -> (i32, i32, i32) {
    %c0_i32 = arith.constant 0 : i32
    %c0_i32_0 = arith.constant 0 : i32
    %c0_i32_1 = arith.constant 0 : i32
    return %arg1, %c0_i32, %c0_i32_0 : i32, i32, i32
  }
  func.func @transform_4(%arg0: i32, %arg1: i32) -> (i32, i32, i32) {
    %c0_i32 = arith.constant 0 : i32
    %c0_i32_0 = arith.constant 0 : i32
    %c0_i32_1 = arith.constant 0 : i32
    return %arg1, %c0_i32, %c0_i32_0 : i32, i32, i32
  }
  func.func @transform_5(%arg0: i32, %arg1: i32) -> (i32, i32, i32) {
    %c0_i32 = arith.constant 0 : i32
    %c0_i32_0 = arith.constant 0 : i32
    %c0_i32_1 = arith.constant 0 : i32
    return %arg1, %c0_i32, %c0_i32_0 : i32, i32, i32
  }
  func.func @transform_6(%arg0: i32, %arg1: i32) -> (i32, i32, i32) {
    %c0_i32 = arith.constant 0 : i32
    %c0_i32_0 = arith.constant 0 : i32
    %c0_i32_1 = arith.constant 0 : i32
    return %arg1, %c0_i32, %c0_i32_0 : i32, i32, i32
  }
  func.func @transform_7(%arg0: i32, %arg1: i32) -> (i32, i32, i32) {
    %c0_i32 = arith.constant 0 : i32
    %c0_i32_0 = arith.constant 0 : i32
    %c0_i32_1 = arith.constant 0 : i32
    return %arg1, %c0_i32, %c0_i32_0 : i32, i32, i32
  }
  func.func @transform_8(%arg0: i32, %arg1: i32) -> (i32, i32, i32) {
    %c0_i32 = arith.constant 0 : i32
    %c0_i32_0 = arith.constant 0 : i32
    %c0_i32_1 = arith.constant 0 : i32
    return %arg1, %c0_i32, %c0_i32_0 : i32, i32, i32
  }
  func.func @transform_9(%arg0: i32, %arg1: i32) -> (i32, i32, i32) {
    %c0_i32 = arith.constant 0 : i32
    %c0_i32_0 = arith.constant 0 : i32
    %c0_i32_1 = arith.constant 0 : i32
    return %arg1, %c0_i32, %c0_i32_0 : i32, i32, i32
  }
  func.func @transform_10(%arg0: i32, %arg1: i32) -> (i32, i32) {
    %c0_i32 = arith.constant 0 : i32
    %c0_i32_0 = arith.constant 0 : i32
    %c0_i32_1 = arith.constant 0 : i32
    return %c0_i32, %c0_i32_0 : i32, i32
  }
  func.func @transform_11(%arg0: i32, %arg1: i32) -> (i32, i32, i32) {
    %c0_i32 = arith.constant 0 : i32
    %c0_i32_0 = arith.constant 0 : i32
    %c0_i32_1 = arith.constant 0 : i32
    return %arg0, %c0_i32, %c0_i32_0 : i32, i32, i32
  }
  func.func @transform_12(%arg0: i32, %arg1: i32) -> (i32, i32, i32) {
    %c0_i32 = arith.constant 0 : i32
    %c0_i32_0 = arith.constant 0 : i32
    %c0_i32_1 = arith.constant 0 : i32
    return %arg0, %c0_i32, %c0_i32_0 : i32, i32, i32
  }
}

</mosaic_0001>

<bundles_post_ra>
// kernel: tpu_custom_call.1
= control target key start
LH: loop header
LB: loop body
LE: loop exit
PB: predicated region body
PF: predicated region fallthrough
CT: control target
= control target key end

     0   :  { %s3086_s0 = inlined_call_operand.hbm [shape: f32[2,8,32], index: 0, kind: input, shape index: {}]   ;;  %s3087_s1 = inlined_call_operand.hbm [shape: f32[1,32], index: 1, kind: input, shape index: {}]   ;;  %s3088_s2 = inlined_call_operand.hbm [shape: f32[1,32], index: 2, kind: input, shape index: {}]   ;;  %s3089_s3 = inlined_call_operand.hbm [shape: bf16[4,32,8], index: 3, kind: input, shape index: {}]   ;;  %s3090_s4 = inlined_call_operand.hbm [shape: f32[4,1,8], index: 4, kind: input, shape index: {}]   ;;  %s3091_s5 = inlined_call_operand.hbm [shape: bf16[4,32,8], index: 5, kind: input, shape index: {}]   ;;  %s3092_s6 = inlined_call_operand.hbm [shape: f32[4,1,8], index: 6, kind: input, shape index: {}]   ;;  %s3093_s7 = inlined_call_operand.hbm [shape: bf16[4,32,8], index: 7, kind: input, shape index: {}]   ;;  %s3094_s8 = inlined_call_operand.hbm [shape: f32[4,1,8], index: 8, kind: input, shape index: {}]   ;;  %s3095_s9 = inlined_call_operand.hbm [shape: bf16[4,8,32], index: 9, kind: input, shape index: {}]   ;;  %s3096_s10 = inlined_call_operand.hbm [shape: f32[1,32], index: 10, kind: input, shape index: {}]   ;;  %s3097_s11 = inlined_call_operand.hbm [shape: s8[2,8,8], index: 11, kind: input, shape index: {}]   ;;  %s3098_s12 = inlined_call_operand.hbm [shape: f32[2,8,32], index: 12, kind: output, shape index: {}]  }
   0x1   :  { %3134 = sst [smem:[#allocation43_spill]] %s3086_s0 }
   0x2   :  { %3135 = sst [smem:[#allocation44_spill]] %s3087_s1 }
   0x3   :  { %3136 = sst [smem:[#allocation45_spill]] %s3088_s2 }
   0x4   :  { %3137 = sst [smem:[#allocation46_spill]] %s3089_s3 }
   0x5   :  { %3138 = sst [smem:[#allocation47_spill]] %s3090_s4 }
   0x6   :  { %3139 = sst [smem:[#allocation48_spill]] %s3091_s5 }
   0x7   :  { %3140 = sst [smem:[#allocation49_spill]] %s3092_s6 }
   0x8   :  { %3141 = sst [smem:[#allocation50_spill]] %s3093_s7 }
   0x9   :  { %3142 = sst [smem:[#allocation51_spill]] %s3094_s8 }
   0xa   :  { %3143 = sst [smem:[#allocation52_spill]] %s3095_s9 }
   0xb   :  { %3144 = sst [smem:[#allocation53_spill]] %s3096_s10 }
   0xc   :  { %3145 = sst [smem:[#allocation54_spill]] %s3097_s11 }
   0xd   :  { %3146 = sst [smem:[#allocation55_spill]] %s3098_s12 }
   0xe   :  { %17 = vsyncpa [#allocation3], 0 }
   0xf   :  { %19 = vsyncpa [#allocation3 + $0x1], 0 }
  0x10   :  { %20 = vsyncpa [#allocation6], 0 }
  0x11   :  { %21 = vsyncpa [#allocation9], 0 }
  0x12   :  { %23 = vsyncpa [#allocation9 + $0x1], 0 }
  0x13   :  { %24 = vsyncpa [#allocation12], 0 }
  0x14   :  { %26 = vsyncpa [#allocation12 + $0x1], 0 }
  0x15   :  { %27 = vsyncpa [#allocation15], 0 }
  0x16   :  { %29 = vsyncpa [#allocation15 + $0x1], 0 }
  0x17   :  { %30 = vsyncpa [#allocation18], 0 }
  0x18   :  { %32 = vsyncpa [#allocation18 + $0x1], 0 }
  0x19   :  { %33 = vsyncpa [#allocation21], 0 }
  0x1a   :  { %35 = vsyncpa [#allocation21 + $0x1], 0 }
  0x1b   :  { %36 = vsyncpa [#allocation4], 0 }
  0x1c   :  { %38 = vsyncpa [#allocation4 + $0x1], 0  ;;  %s2371_s21 = smov 0   ;;  %s2373_s22 = smov 0  }
  0x1d   :  { %s2375_s23 = smov 0   ;;  %s2377_s24 = smov 0  }
  0x1e   :  { %s2379_s25 = smov 0   ;;  %s2381_s26 = smov 0  }
  0x1f   :  { %s2383_s27 = smov 0   ;;  %s2385_s28 = smov 0  }
  0x20   :  { %s2387_s29 = smov 0   ;;  %s2389_s30 = smov 0  }
  0x21   :  { %s2391_s13 = smov 0  }
  0x22 LB: > { %3147 = sst [smem:[#allocation32_spill]] %s2250_s22  ;;  %s2425_s14 = sadd.s32 4294967295, %s2286_s13   ;;  %s2286_s13 = sphi %s2391_s13, %s44_s13   ;;  %s2282_s30 = sphi %s2389_s30, %s3231_s30   ;;  %s2278_s29 = sphi %s2387_s29, %s3230_s29   ;;  %s2274_s28 = sphi %s2385_s28, %s3229_s28   ;;  %s2270_s27 = sphi %s2383_s27, %s3228_s27   ;;  %s2266_s26 = sphi %s2381_s26, %s3221_s26   ;;  %s2262_s25 = sphi %s2379_s25, %s3227_s25   ;;  %s2258_s24 = sphi %s2377_s24, %s3226_s24   ;;  %s2254_s23 = sphi %s2375_s23, %s3225_s23   ;;  %s2250_s22 = sphi %s2373_s22, %s3224_s22   ;;  %s2246_s21 = sphi %s2371_s21, %s3218_s21  }
  0x23   : > { %3148 = sst [smem:[#allocation33_spill]] %s2266_s26  ;;  %p3107_p0 = scmp.eq.s32.totalorder %s2286_s13, 0 }
  0x24   : > { %3149 = sst [smem:[#allocation34_spill]] %s2270_s27  ;;  %p3106_p1 = scmp.eq.s32.totalorder %s2425_s14, 0 }
  0x25   : > { %3150 = sst [smem:[#allocation35_spill]] %s2274_s28  ;;  %p138_p2 = scmp.ne.s32.totalorder %s2254_s23, %s2250_s22 }
  0x26   : > { %p144_p3 = scmp.ne.s32.totalorder %s2250_s22, %s2246_s21  ;;  %p1473_p4 = scmp.ge.s32.totalorder %s2286_s13, 1 }
  0x27   : > { %p384_p5 = scmp.lt.s32.totalorder %s2286_s13, 9  ;;  %p140_p6 = por %p138_p2, %p3107_p0 }
  0x28   : > { %p2439_p7 = por %p144_p3, %p3106_p1  ;;  %s2288_s18 = smov [#allocation5]  }
  0x29   : > { %p2443_p8 = pnand %p1473_p4, %p384_p5  ;;  %s397_s19 = sshll.u32 %s2288_s18, 4  ;;  %s398_s19 = int_to_ptr.vmem [resolvable:$true] %s397_s19 }
  0x2a   : > { %s3151_s16 = scalar_select %p2439_p7, 1, 0 }
  0x2b   : > { %s3153_s17 = scalar_select %p2443_p8, 1, 0 }
  0x2c   : > { %3152 = sst [smem:[#allocation36_spill]] %s3151_s16  ;;  %p1622_p9 = pneg %p2443_p8 }
  0x2d   : > { %3154 = sst [smem:[#allocation37_spill]] %s3153_s17  ;;  %p3105_p10 = scmp.lt.s32.totalorder %s2286_s13, 8 }
  0x2e   : > { %p2452_p11 = pnand %p1622_p9, %p3106_p1  ;;  %s2289_s15 = smov [#allocation19]  }
  0x2f   : > { %p2458_p12 = pnand %p3105_p10, %p140_p6  ;;  %s419_s12 = sshll.u32 %s2289_s15, 4  ;;  %s2462_s12 = int_to_ptr.vmem [resolvable:$true] %s419_s12 }
  0x30   : > { %s3155_s20 = scalar_select %p2452_p11, 1, 0 }
  0x31   : > { %s3156_s21 = scalar_select %p2458_p12, 1, 0 }
  0x32   : > { %s3157_s1 = sld [smem:[#allocation44_spill]]  ;;  %p2472_p2 = pneg %p2452_p11 }
  0x34   : > { %s3158_s17 = scalar_select %p2472_p2, 1, 0 }
  0x38   : > { %s1782_s18 = scalar_lea.hbm %s3157_s1, 16 }
  0x39   : > { %p1783_p13 = scmp.ne.s32.totalorder %s3157_s1, %s1782_s18  ;;  %p1789_p5 = scmp.lt.u32.totalorder %s1782_s18, %s3157_s1 }
  0x3b   : > { %p1785_p3 = pnand %p2472_p2, %p1783_p13 }
  0x3d   : > { %p1786_p4 = pneg %p1785_p3 }
  0x3f   : > { %p1791_p6 = pnand %p1789_p5, %p1786_p4 }
  0x41   : > { %1794 = shalt.err (!%p1791_p6)
}
  0x42   : > { %s1795_s27 = scalar_lea.vmem %s398_s19, 16  ;;  %s1802_s22 = scalar_lea.vmem %s398_s19, 32 }
  0x43   : > { %p1796_p9 = scmp.ne.s32.totalorder %s398_s19, %s1795_s27  ;;  %p1803_p0 = scmp.lt.s32.totalorder %s398_s19, %s398_s19 }
  0x44   : > { %p1804_p7 = scmp.lt.s32.totalorder %s1802_s22, %s1795_s27 }
  0x45   : > { %p1798_p10 = pnand %p1796_p9, %p2472_p2 }
  0x46   : > { %p1805_p8 = por %p1804_p7, %p1803_p0 }
  0x47   : > { %p1799_p1 = pneg %p1798_p10 }
  0x49   : > { %p1806_p12 = pnand %p1805_p8, %p1799_p1 }
  0x4b   : > { %1809 = shalt.err (!%p1806_p12)
}
  0x4c   : > { %1625 = dma.hbm_to_vmem [thread:$0]  (!%p2452_p11), %s3157_s1, 16, %s398_s19, [#allocation6]  }
  0x4d   : > { %s3159_s10 = sld [smem:[#allocation53_spill]] }
  0x53   : > { %s1810_s15 = scalar_lea.hbm %s3159_s10, 16 }
  0x54   : > { %p1811_p10 = scmp.ne.s32.totalorder %s3159_s10, %s1810_s15  ;;  %p1817_p1 = scmp.lt.u32.totalorder %s1810_s15, %s3159_s10 }
  0x56   : > { %p1813_p13 = pnand %p1811_p10, %p2472_p2 }
  0x58   : > { %p1814_p0 = pneg %p1813_p13 }
  0x5a   : > { %p1819_p7 = pnand %p1817_p1, %p1814_p0 }
  0x5c   : > { %1822 = shalt.err (!%p1819_p7)
}
  0x5d   : > { %s1823_s19 = scalar_lea.vmem %s2462_s12, 16  ;;  %s1830_s8 = scalar_lea.vmem %s2462_s12, 32 }
  0x5e   : > { %p1824_p8 = scmp.ne.s32.totalorder %s2462_s12, %s1823_s19  ;;  %p1831_p4 = scmp.lt.s32.totalorder %s2462_s12, %s2462_s12 }
  0x5f   : > { %p1832_p5 = scmp.lt.s32.totalorder %s1830_s8, %s1823_s19 }
  0x60   : > { %p1826_p12 = pnand %p1824_p8, %p2472_p2 }
  0x61   : > { %p1833_p6 = por %p1832_p5, %p1831_p4 }
  0x62   : > { %p1827_p3 = pneg %p1826_p12 }
  0x64   : > { %p1834_p9 = pnand %p1833_p6, %p1827_p3 }
  0x66   : > { %1837 = shalt.err (!%p1834_p9)
}
  0x67   : > { %1631 = dma.hbm_to_vmem [thread:$0]  (!%p2452_p11), %s3159_s10, 16, %s2462_s12, [#allocation18]  }
  0x68   : > { %s2513_s16 = sand.u32 1, %s2286_s13   ;;  %s2516_s11 = sand.u32 1, %s2254_s23  }
  0x69   : > { %3160 = sst [smem:[#allocation38_spill]] %s2516_s11  ;;  %s2519_s18 = sshll.u32 %s2516_s11, 4 }
  0x6a   : > { %s2522_s15 = sshll.u32 %s2278_s29, 8  ;;  %s3161_s3 = sld [smem:[#allocation46_spill]] }
  0x6b   : > { %s452_s12 = scalar_lea.vmem [#allocation8], %s2519_s18  ;;  %p3162_p13 = scmp.ne.s32.totalorder %s3156_s21, 0 }
  0x6c   : > { %s459_s8 = sshll.u32 %s452_s12, 4  ;;  %s2531_s8 = int_to_ptr.vmem [resolvable:$true] %s459_s8 }
  0x6d   : > { %p2538_p0 = pneg %p3162_p13 }
  0x70   : > { %s2528_s19 = scalar_lea.hbm %s3161_s3, %s2522_s15  ;;  %s1843_s10 = scalar_lea.hbm %s3161_s3, 1024 }
  0x71   : > { %s1838_s28 = scalar_lea.hbm %s2528_s19, 256  ;;  %p1844_p8 = scmp.lt.u32.totalorder %s2528_s19, %s3161_s3 }
  0x72   : > { %p1839_p10 = scmp.ne.s32.totalorder %s2528_s19, %s1838_s28  ;;  %p1845_p12 = scmp.lt.u32.totalorder %s1843_s10, %s1838_s28 }
  0x73   : > { %p1847_p4 = scmp.lt.u32.totalorder %s1838_s28, %s2528_s19 }
  0x74   : > { %p1841_p1 = pnand %p2538_p0, %p1839_p10  ;;  %p1846_p3 = por %p1845_p12, %p1844_p8 }
  0x76   : > { %p1842_p7 = pneg %p1841_p1  ;;  %p1848_p5 = por %p1847_p4, %p1846_p3 }
  0x78   : > { %p1849_p6 = pnand %p1848_p5, %p1842_p7 }
  0x7a   : > { %1852 = shalt.err (!%p1849_p6)
}
  0x7b   : > { %s1853_s9 = scalar_lea.vmem %s2531_s8, 256  ;;  %s2290_s27 = smov [#allocation8]  }
  0x7c   : > { %p1854_p9 = scmp.ne.s32.totalorder %s2531_s8, %s1853_s9  ;;  %s1858_s22 = sshll.u32 %s2290_s27, 4  ;;  %s1859_s22 = int_to_ptr.vmem [resolvable:$false] %s1858_s22 }
  0x7d   : > { %s1860_s6 = scalar_lea.vmem %s1859_s22, 512  ;;  %p1861_p11 = scmp.lt.s32.totalorder %s2531_s8, %s1859_s22 }
  0x7e   : > { %p1856_p10 = pnand %p1854_p9, %p2538_p0  ;;  %p1862_p2 = scmp.lt.s32.totalorder %s1860_s6, %s1853_s9 }
  0x80   : > { %p1857_p1 = pneg %p1856_p10  ;;  %p1863_p8 = por %p1862_p2, %p1861_p11 }
  0x82   : > { %p1864_p12 = pnand %p1863_p8, %p1857_p1 }
  0x84   : > { %1867 = shalt.err (!%p1864_p12)
}
  0x85   : > { %s2291_s10 = smov 64   ;;  %s2292_s28 = smov 4  }
  0x86   : > { %s3164_s12 = scalar_lea.sflag [#allocation9], %s2513_s16  ;;  %s3165_s5 = sld [smem:[#allocation48_spill]] }
  0x87   : > { %1638 = dma.hbm_to_vmem [thread:$0]  (!%p3162_p13), %s2528_s19, 256, %s2531_s8, %s3164_s12, %s2291_s10, %s2291_s10, %s2292_s28  }
  0x88   : > { %s490_s6 = scalar_lea.vmem [#allocation11], %s2519_s18  ;;  %s3123_s4 = scalar_lea.sflag [#allocation12], %s2513_s16 }
  0x89   : > { %s497_s3 = sshll.u32 %s490_s6, 4  ;;  %s2573_s3 = int_to_ptr.vmem [resolvable:$true] %s497_s3 }
  0x8c   : > { %s2570_s22 = scalar_lea.hbm %s3165_s5, %s2522_s15  ;;  %s1873_s12 = scalar_lea.hbm %s3165_s5, 1024 }
  0x8d   : > { %s1868_s11 = scalar_lea.hbm %s2570_s22, 256  ;;  %p1874_p3 = scmp.lt.u32.totalorder %s2570_s22, %s3165_s5 }
  0x8e   : > { %p1869_p11 = scmp.ne.s32.totalorder %s2570_s22, %s1868_s11  ;;  %p1875_p4 = scmp.lt.u32.totalorder %s1873_s12, %s1868_s11 }
  0x8f   : > { %p1877_p6 = scmp.lt.u32.totalorder %s1868_s11, %s2570_s22 }
  0x90   : > { %p1871_p2 = pnand %p1869_p11, %p2538_p0  ;;  %p1876_p5 = por %p1875_p4, %p1874_p3 }
  0x92   : > { %p1872_p7 = pneg %p1871_p2  ;;  %p1878_p9 = por %p1877_p6, %p1876_p5 }
  0x94   : > { %p1879_p10 = pnand %p1878_p9, %p1872_p7 }
  0x96   : > { %1882 = shalt.err (!%p1879_p10)
}
  0x97   : > { %s1883_s6 = scalar_lea.vmem %s2573_s3, 256  ;;  %s2293_s19 = smov [#allocation11]  }
  0x98   : > { %p1884_p1 = scmp.ne.s32.totalorder %s2573_s3, %s1883_s6  ;;  %s1888_s8 = sshll.u32 %s2293_s19, 4  ;;  %s1889_s8 = int_to_ptr.vmem [resolvable:$false] %s1888_s8 }
  0x99   : > { %s1890_s9 = scalar_lea.vmem %s1889_s8, 512  ;;  %p1891_p11 = scmp.lt.s32.totalorder %s2573_s3, %s1889_s8 }
  0x9a   : > { %p1886_p8 = pnand %p1884_p1, %p2538_p0  ;;  %p1892_p2 = scmp.lt.s32.totalorder %s1890_s9, %s1883_s6 }
  0x9c   : > { %p1887_p12 = pneg %p1886_p8  ;;  %p1893_p3 = por %p1892_p2, %p1891_p11 }
  0x9e   : > { %p1894_p4 = pnand %p1893_p3, %p1887_p12 }
  0xa0   : > { %1897 = shalt.err (!%p1894_p4)
}
  0xa1   : > { %1644 = dma.hbm_to_vmem [thread:$0]  (!%p3162_p13), %s2570_s22, 256, %s2573_s3, %s3123_s4, %s2291_s10, %s2291_s10, %s2292_s28  }
  0xa2   : > { %s3166_s7 = sld [smem:[#allocation50_spill]]  ;;  %s528_s6 = scalar_lea.vmem [#allocation14], %s2519_s18 }
  0xa3   : > { %s535_s19 = sshll.u32 %s528_s6, 4  ;;  %s2294_s8 = smov [#allocation7]   ;;  %s2609_s19 = int_to_ptr.vmem [resolvable:$true] %s535_s19 }
  0xa4   : > { %s2611_s9 = sshll.u32 %s2294_s8, 4  ;;  %s3122_s5 = scalar_lea.sflag [#allocation15], %s2513_s16  ;;  %s409_s9 = int_to_ptr.vmem [resolvable:$true] %s2611_s9 }
  0xa8   : > { %s2606_s27 = scalar_lea.hbm %s3166_s7, %s2522_s15  ;;  %s1903_s22 = scalar_lea.hbm %s3166_s7, 1024 }
  0xa9   : > { %s1898_s0 = scalar_lea.hbm %s2606_s27, 256  ;;  %p1904_p9 = scmp.lt.u32.totalorder %s2606_s27, %s3166_s7 }
  0xaa   : > { %p1899_p7 = scmp.ne.s32.totalorder %s2606_s27, %s1898_s0  ;;  %p1905_p10 = scmp.lt.u32.totalorder %s1903_s22, %s1898_s0 }
  0xab   : > { %p1907_p8 = scmp.lt.u32.totalorder %s1898_s0, %s2606_s27 }
  0xac   : > { %p1901_p5 = pnand %p1899_p7, %p2538_p0  ;;  %p1906_p1 = por %p1905_p10, %p1904_p9 }
  0xae   : > { %p1902_p6 = pneg %p1901_p5  ;;  %p1908_p12 = por %p1907_p8, %p1906_p1 }
  0xb0   : > { %p1909_p11 = pnand %p1908_p12, %p1902_p6 }
  0xb2   : > { %1912 = shalt.err (!%p1909_p11)
}
  0xb3   : > { %s1913_s18 = scalar_lea.vmem %s2609_s19, 256  ;;  %s2295_s6 = smov [#allocation14]  }
  0xb4   : > { %p1914_p2 = scmp.ne.s32.totalorder %s2609_s19, %s1913_s18  ;;  %s1918_s8 = sshll.u32 %s2295_s6, 4  ;;  %s1919_s8 = int_to_ptr.vmem [resolvable:$false] %s1918_s8 }
  0xb5   : > { %s1920_s3 = scalar_lea.vmem %s1919_s8, 512  ;;  %p1921_p7 = scmp.lt.s32.totalorder %s2609_s19, %s1919_s8 }
  0xb6   : > { %p1916_p3 = pnand %p1914_p2, %p2538_p0  ;;  %p1922_p5 = scmp.lt.s32.totalorder %s1920_s3, %s1913_s18 }
  0xb8   : > { %p1917_p4 = pneg %p1916_p3  ;;  %p1923_p9 = por %p1922_p5, %p1921_p7 }
  0xba   : > { %p1924_p10 = pnand %p1923_p9, %p1917_p4 }
  0xbc   : > { %1927 = shalt.err (!%p1924_p10)
}
  0xbd   : > { %1650 = dma.hbm_to_vmem [thread:$0]  (!%p3162_p13), %s2606_s27, 256, %s2609_s19, %s3122_s5, %s2291_s10, %s2291_s10, %s2292_s28  }
  0xbe   : > { %s3167_s2 = sld [smem:[#allocation45_spill]]  ;;  %p3168_p1 = scmp.ne.s32.totalorder %s3158_s17, 0 }
  0xc4   : > { %s1928_s22 = scalar_lea.hbm %s3167_s2, 16 }
  0xc5   : > { %p1929_p6 = scmp.ne.s32.totalorder %s3167_s2, %s1928_s22  ;;  %p1935_p11 = scmp.lt.u32.totalorder %s1928_s22, %s3167_s2 }
  0xc7   : > { %p1931_p8 = pnand %p1929_p6, %p3168_p1 }
  0xc9   : > { %p1932_p12 = pneg %p1931_p8 }
  0xcb   : > { %p1937_p2 = pnand %p1935_p11, %p1932_p12 }
  0xcd   : > { %1940 = shalt.err (!%p1937_p2)
}
  0xce   : > { %s1941_s8 = scalar_lea.vmem %s409_s9, 16  ;;  %s1948_s10 = scalar_lea.vmem %s409_s9, 32 }
  0xcf   : > { %p1942_p3 = scmp.ne.s32.totalorder %s409_s9, %s1941_s8  ;;  %p1949_p5 = scmp.lt.s32.totalorder %s409_s9, %s409_s9 }
  0xd0   : > { %p1950_p9 = scmp.lt.s32.totalorder %s1948_s10, %s1941_s8 }
  0xd1   : > { %p1944_p4 = pnand %p1942_p3, %p3168_p1 }
  0xd2   : > { %p1951_p10 = por %p1950_p9, %p1949_p5 }
  0xd3   : > { %p1945_p7 = pneg %p1944_p4 }
  0xd5   : > { %p1952_p13 = pnand %p1951_p10, %p1945_p7 }
  0xd7   : > { %1955 = shalt.err (!%p1952_p13)
}
  0xd8   : > { %p3169_p6 = scmp.ne.s32.totalorder %s3155_s20, 0  ;;  %s1472_s17 = sadd.s32 4294967294, %s2286_s13  }
  0xd9   : > { %s53_s20 = sadd.s32 1, %s2278_s29  ;;  %s56_s19 = sadd.s32 1, %s2282_s30 }
  0xda   : > { %1628 = dma.hbm_to_vmem [thread:$0]  (!%p3169_p6), %s3167_s2, 16, %s409_s9, [#allocation6]  }
  0xdb   : > { %p54_p13 = scmp.ge.s32.totalorder %s53_s20, 4  ;;  %s63_s3 = sadd.s32 1, %s2266_s26 }
  0xdc   : > { %p70_p1 = scmp.ne.s32.totalorder %s2266_s26, %s2262_s25  ;;  %p76_p8 = scmp.ne.s32.totalorder %s2262_s25, %s2258_s24 }
  0xdd   : > { %s3233_s20 = smov (%p54_p13, %s53_s20), 0  ;;  %s3235_s19 = smov (!%p54_p13, %s56_s19), %s2282_s30 }
  0xde   : > { %3170 = sst [smem:[#allocation39_spill]] %s3233_s20  ;;  %p3171_p12 = scmp.eq.s32.totalorder %s2286_s13, 0 }
  0xdf   : > { %p3173_p2 = scmp.eq.s32.totalorder %s2425_s14, 0  ;;  %p58_p4 = scmp.ge.s32.totalorder %s3235_s19, 2 }
  0xe0   : > { %p2675_p11 = por %p3171_p12, %p70_p1  ;;  %s128_s15 = ssub.s32 %s2278_s29, %s3233_s20 }
  0xe1   : > { %p2684_p3 = por %p3173_p2, %p76_p8  ;;  %p129_p7 = scmp.eq.s32.totalorder %s128_s15, 0 }
  0xe2   : > { %p371_p5 = scmp.eq.s32.totalorder %s2425_s14, 7  ;;  %s3237_s19 = smov (%p58_p4, %s3235_s19), 0 }
  0xe3   : > { %s3174_s0 = scalar_select %p2684_p3, 1, 0 }
  0xe4   : > { %3175 = sst [smem:[#allocation40_spill]] %s3237_s19  ;;  %s3176_s22 = sadd.s32 1, %s2254_s23 }
  0xe5   : > { %s2696_s11 = scalar_select %p129_p7, %s2254_s23, %s3176_s22  }
  0xe6   : > { %s60_s12 = ssub.s32 %s2282_s30, %s3237_s19  ;;  %p2703_p9 = por %p371_p5, %p70_p1 }
  0xe7   : > { %3177 = sst [smem:[#allocation41_spill]] %s2696_s11  ;;  %p61_p10 = scmp.eq.s32.totalorder %s60_s12, 0 }
  0xe8   : > { %s3178_s18 = scalar_select %p2703_p9, 1, 0 }
  0xe9   : > { %p377_p6 = scmp.eq.s32.totalorder %s1472_s17, 7  ;;  %s2708_s6 = sand.u32 1, %s2266_s26  }
  0xea   : > { %s1479_s8 = sshll.u32 %s2282_s30, 7  ;;  %s1478_s27 = sshll.u32 %s2708_s6, 3 }
  0xeb   : > { %s2712_s10 = scalar_select %p61_p10, %s2266_s26, %s63_s3  }
  0xec   : > { %p2717_p13 = por %p377_p6, %p76_p8  ;;  %s3181_s5 = sld [smem:[#allocation43_spill]] }
  0xed   : > { %3179 = sst [smem:[#allocation42_spill]] %s2712_s10  ;;  %p3182_p1 = scmp.lt.s32.totalorder %s2286_s13, 8 }
  0xee   : > { %s3180_s28 = scalar_select %p2717_p13, 1, 0 }
  0xef   : > { %p2731_p12 = pnand %p3182_p1, %p2675_p11  ;;  %s434_s3 = scalar_lea.vmem [#allocation2], %s1478_s27 }
  0xf0   : > { %s441_s12 = sshll.u32 %s434_s3, 4  ;;  %s431_s2 = scalar_lea.sflag [#allocation3], %s2708_s6  ;;  %s2735_s12 = int_to_ptr.vmem [resolvable:$true] %s441_s12 }
  0xf1   : > { %s3183_s17 = scalar_select %p2731_p12, 1, 0 }
  0xf2   : > { %s2725_s4 = scalar_lea.hbm %s3181_s5, %s1479_s8  ;;  %p3130_p2 = pneg %p2731_p12 }
  0xf3   : > { %s1956_s15 = scalar_lea.hbm %s2725_s4, 128  ;;  %s1961_s22 = scalar_lea.hbm %s3181_s5, 256 }
  0xf4   : > { %p1957_p8 = scmp.ne.s32.totalorder %s2725_s4, %s1956_s15  ;;  %p1962_p11 = scmp.lt.u32.totalorder %s2725_s4, %s3181_s5 }
  0xf5   : > { %p1963_p5 = scmp.lt.u32.totalorder %s1961_s22, %s1956_s15  ;;  %p1965_p6 = scmp.lt.u32.totalorder %s1956_s15, %s2725_s4 }
  0xf6   : > { %p1959_p4 = pnand %p3130_p2, %p1957_p8 }
  0xf7   : > { %p1964_p10 = por %p1963_p5, %p1962_p11 }
  0xf8   : > { %p1960_p7 = pneg %p1959_p4 }
  0xf9   : > { %p1966_p1 = por %p1965_p6, %p1964_p10 }
  0xfb   : > { %p1967_p13 = pnand %p1966_p1, %p1960_p7 }
  0xfd   : > { %1970 = shalt.err (!%p1967_p13)
}
  0xfe   : > { %s1971_s27 = scalar_lea.vmem %s2735_s12, 128  ;;  %s2296_s3 = smov [#allocation2]  }
  0xff   : > { %p1972_p8 = scmp.ne.s32.totalorder %s2735_s12, %s1971_s27  ;;  %s1976_s9 = sshll.u32 %s2296_s3, 4  ;;  %s1977_s9 = int_to_ptr.vmem [resolvable:$false] %s1976_s9 }
 0x100   : > { %s1978_s7 = scalar_lea.vmem %s1977_s9, 256  ;;  %p1979_p3 = scmp.lt.s32.totalorder %s2735_s12, %s1977_s9 }
 0x101   : > { %p1974_p4 = pnand %p1972_p8, %p3130_p2  ;;  %p1980_p11 = scmp.lt.s32.totalorder %s1978_s7, %s1971_s27 }
 0x103   : > { %p1975_p9 = pneg %p1974_p4  ;;  %p1981_p5 = por %p1980_p11, %p1979_p3 }
 0x105   : > { %p1982_p10 = pnand %p1981_p5, %p1975_p9 }
 0x107   : > { %1985 = shalt.err (!%p1982_p10)
}
 0x108   : > { %s3184_s19 = sld [smem:[#allocation38_spill]]  ;;  %s2764_s15 = sshll.u32 %s2278_s29, 4 }
 0x109   : > { %1635 = dma.hbm_to_vmem [thread:$0]  (!%p2731_p12), %s2725_s4, 128, %s2735_s12, %s431_s2  }
 0x10a   : > { %s3185_s9 = sld [smem:[#allocation47_spill]] }
 0x10e   : > { %s472_s8 = scalar_lea.vmem [#allocation10], %s3184_s19 }
 0x10f   : > { %s479_s22 = sshll.u32 %s472_s8, 4  ;;  %s480_s22 = int_to_ptr.vmem [resolvable:$true] %s479_s22 }
 0x110   : > { %s477_s27 = scalar_lea.hbm %s3185_s9, %s2764_s15  ;;  %s1991_s26 = scalar_lea.hbm %s3185_s9, 64 }
 0x111   : > { %s1986_s7 = scalar_lea.hbm %s477_s27, 16  ;;  %p1992_p7 = scmp.lt.u32.totalorder %s477_s27, %s3185_s9 }
 0x112   : > { %p1987_p3 = scmp.ne.s32.totalorder %s477_s27, %s1986_s7  ;;  %p1993_p6 = scmp.lt.u32.totalorder %s1991_s26, %s1986_s7 }
 0x113   : > { %p1995_p8 = scmp.lt.u32.totalorder %s1986_s7, %s477_s27 }
 0x114   : > { %p1989_p9 = pnand %p1987_p3, %p2538_p0  ;;  %p1994_p1 = por %p1993_p6, %p1992_p7 }
 0x116   : > { %p1990_p13 = pneg %p1989_p9  ;;  %p1996_p4 = por %p1995_p8, %p1994_p1 }
 0x118   : > { %p1997_p11 = pnand %p1996_p4, %p1990_p13 }
 0x11a   : > { %2000 = shalt.err (!%p1997_p11)
}
 0x11b   : > { %s2001_s5 = scalar_lea.vmem %s480_s22, 16  ;;  %s2297_s12 = smov [#allocation10]  }
 0x11c   : > { %p2002_p5 = scmp.ne.s32.totalorder %s480_s22, %s2001_s5  ;;  %s2006_s8 = sshll.u32 %s2297_s12, 4  ;;  %s2007_s8 = int_to_ptr.vmem [resolvable:$false] %s2006_s8 }
 0x11d   : > { %s2008_s20 = scalar_lea.vmem %s2007_s8, 32  ;;  %p2009_p9 = scmp.lt.s32.totalorder %s480_s22, %s2007_s8 }
 0x11e   : > { %p2004_p10 = pnand %p2002_p5, %p2538_p0  ;;  %p2010_p2 = scmp.lt.s32.totalorder %s2008_s20, %s2001_s5 }
 0x120   : > { %p2005_p3 = pneg %p2004_p10  ;;  %p2011_p12 = por %p2010_p2, %p2009_p9 }
 0x122   : > { %p2012_p6 = pnand %p2011_p12, %p2005_p3 }
 0x124   : > { %2015 = shalt.err (!%p2012_p6)
}
 0x125   : > { %p3186_p7 = scmp.ne.s32.totalorder %s3156_s21, 0  ;;  %s3187_s26 = scalar_lea.sflag [#allocation9], %s2513_s16 }
 0x126   : > { %s3188_s7 = sld [smem:[#allocation49_spill]]  ;;  %s510_s4 = scalar_lea.vmem [#allocation13], %s3184_s19 }
 0x127   : > { %1641 = dma.hbm_to_vmem [thread:$0]  (!%p3186_p7), %s477_s27, 16, %s480_s22, %s3187_s26  }
 0x128   : > { %s517_s5 = sshll.u32 %s510_s4, 4  ;;  %s3189_s20 = sld [smem:[#allocation51_spill]]  ;;  %s518_s5 = int_to_ptr.vmem [resolvable:$true] %s517_s5 }
 0x12c   : > { %s2789_s2 = scalar_lea.hbm %s3188_s7, %s2764_s15  ;;  %s2021_s26 = scalar_lea.hbm %s3188_s7, 64 }
 0x12d   : > { %s2016_s11 = scalar_lea.hbm %s2789_s2, 16  ;;  %p2022_p1 = scmp.lt.u32.totalorder %s2789_s2, %s3188_s7 }
 0x12e   : > { %s2796_s9 = scalar_lea.hbm %s3189_s20, %s2764_s15  ;;  %p2017_p12 = scmp.ne.s32.totalorder %s2789_s2, %s2016_s11 }
 0x12f   : > { %p2023_p8 = scmp.lt.u32.totalorder %s2021_s26, %s2016_s11  ;;  %p2025_p11 = scmp.lt.u32.totalorder %s2016_s11, %s2789_s2 }
 0x130   : > { %p2019_p2 = pnand %p2017_p12, %p2538_p0 }
 0x131   : > { %p2024_p4 = por %p2023_p8, %p2022_p1 }
 0x132   : > { %p2020_p13 = pneg %p2019_p2 }
 0x133   : > { %p2026_p5 = por %p2025_p11, %p2024_p4 }
 0x135   : > { %p2027_p10 = pnand %p2026_p5, %p2020_p13 }
 0x137   : > { %2030 = shalt.err (!%p2027_p10)
}
 0x138   : > { %s2031_s15 = scalar_lea.vmem %s518_s5, 16  ;;  %s2298_s4 = smov [#allocation13]  }
 0x139   : > { %p2032_p3 = scmp.ne.s32.totalorder %s518_s5, %s2031_s15  ;;  %s2036_s12 = sshll.u32 %s2298_s4, 4  ;;  %s2037_s12 = int_to_ptr.vmem [resolvable:$false] %s2036_s12 }
 0x13a   : > { %s2038_s8 = scalar_lea.vmem %s2037_s12, 32  ;;  %p2039_p12 = scmp.lt.s32.totalorder %s518_s5, %s2037_s12 }
 0x13b   : > { %p2034_p9 = pnand %p2032_p3, %p2538_p0  ;;  %p2040_p2 = scmp.lt.s32.totalorder %s2038_s8, %s2031_s15 }
 0x13d   : > { %p2035_p6 = pneg %p2034_p9  ;;  %p2041_p7 = por %p2040_p2, %p2039_p12 }
 0x13f   : > { %p2042_p1 = pnand %p2041_p7, %p2035_p6 }
 0x141   : > { %2045 = shalt.err (!%p2042_p1)
}
 0x142   : > { %p3190_p8 = scmp.ne.s32.totalorder %s3156_s21, 0  ;;  %s3191_s11 = scalar_lea.sflag [#allocation12], %s2513_s16 }
 0x143   : > { %s548_s22 = scalar_lea.vmem [#allocation16], %s3184_s19  ;;  %s1492_s26 = sshll.u32 %s3184_s19, 2 }
 0x144   : > { %1647 = dma.hbm_to_vmem [thread:$0]  (!%p3190_p8), %s2789_s2, 16, %s518_s5, %s3191_s11  }
 0x145   : > { %s555_s27 = sshll.u32 %s548_s22, 4  ;;  %s2046_s10 = scalar_lea.hbm %s2796_s9, 16  ;;  %s556_s27 = int_to_ptr.vmem [resolvable:$true] %s555_s27 }
 0x146   : > { %p2047_p7 = scmp.ne.s32.totalorder %s2796_s9, %s2046_s10  ;;  %s2051_s4 = scalar_lea.hbm %s3189_s20, 64 }
 0x147   : > { %p2052_p11 = scmp.lt.u32.totalorder %s2796_s9, %s3189_s20  ;;  %p2053_p5 = scmp.lt.u32.totalorder %s2051_s4, %s2046_s10 }
 0x148   : > { %p2049_p13 = pnand %p2047_p7, %p2538_p0  ;;  %p2055_p3 = scmp.lt.u32.totalorder %s2046_s10, %s2796_s9 }
 0x149   : > { %p2054_p10 = por %p2053_p5, %p2052_p11 }
 0x14a   : > { %p2050_p4 = pneg %p2049_p13 }
 0x14b   : > { %p2056_p9 = por %p2055_p3, %p2054_p10 }
 0x14d   : > { %p2057_p6 = pnand %p2056_p9, %p2050_p4 }
 0x14f   : > { %2060 = shalt.err (!%p2057_p6)
}
 0x150   : > { %s2061_s2 = scalar_lea.vmem %s556_s27, 16  ;;  %s2299_s5 = smov [#allocation16]  }
 0x151   : > { %p2062_p12 = scmp.ne.s32.totalorder %s556_s27, %s2061_s2  ;;  %s2066_s11 = sshll.u32 %s2299_s5, 4  ;;  %s2067_s11 = int_to_ptr.vmem [resolvable:$false] %s2066_s11 }
 0x152   : > { %s2068_s22 = scalar_lea.vmem %s2067_s11, 32  ;;  %p2069_p7 = scmp.lt.s32.totalorder %s556_s27, %s2067_s11 }
 0x153   : > { %p2064_p2 = pnand %p2062_p12, %p2538_p0  ;;  %p2070_p13 = scmp.lt.s32.totalorder %s2068_s22, %s2061_s2 }
 0x155   : > { %p2065_p1 = pneg %p2064_p2  ;;  %p2071_p8 = por %p2070_p13, %p2069_p7 }
 0x157   : > { %p2072_p5 = pnand %p2071_p8, %p2065_p1 }
 0x159   : > { %2075 = shalt.err (!%p2072_p5)
}
 0x15a   : > { %p3192_p11 = scmp.ne.s32.totalorder %s3156_s21, 0  ;;  %s3193_s10 = scalar_lea.sflag [#allocation15], %s2513_s16 }
 0x15b   : > { %s1493_s3 = sshll.u32 %s2278_s29, 6  ;;  %s3194_s12 = sld [smem:[#allocation52_spill]] }
 0x15c   : > { %1653 = dma.hbm_to_vmem [thread:$0]  (!%p3192_p11), %s2796_s9, 16, %s556_s27, %s3193_s10  }
 0x15d   : > { %s566_s2 = scalar_lea.vmem [#allocation17], %s1492_s26  ;;  %s563_s11 = scalar_lea.sflag [#allocation18], %s2513_s16 }
 0x15e   : > { %s573_s5 = sshll.u32 %s566_s2, 4  ;;  %s574_s5 = int_to_ptr.vmem [resolvable:$true] %s573_s5 }
 0x161   : > { %s2842_s8 = scalar_lea.hbm %s3194_s12, %s1493_s3  ;;  %s2081_s10 = scalar_lea.hbm %s3194_s12, 256 }
 0x162   : > { %s2076_s22 = scalar_lea.hbm %s2842_s8, 64  ;;  %p2082_p3 = scmp.lt.u32.totalorder %s2842_s8, %s3194_s12 }
 0x163   : > { %p2077_p8 = scmp.ne.s32.totalorder %s2842_s8, %s2076_s22  ;;  %p2083_p9 = scmp.lt.u32.totalorder %s2081_s10, %s2076_s22 }
 0x164   : > { %p2085_p12 = scmp.lt.u32.totalorder %s2076_s22, %s2842_s8 }
 0x165   : > { %p2079_p4 = pnand %p2077_p8, %p2538_p0  ;;  %p2084_p6 = por %p2083_p9, %p2082_p3 }
 0x167   : > { %p2080_p10 = pneg %p2079_p4  ;;  %p2086_p2 = por %p2085_p12, %p2084_p6 }
 0x169   : > { %p2087_p1 = pnand %p2086_p2, %p2080_p10 }
 0x16b   : > { %2090 = shalt.err (!%p2087_p1)
}
 0x16c   : > { %s2091_s16 = scalar_lea.vmem %s574_s5, 64  ;;  %s2300_s19 = smov [#allocation17]  }
 0x16d   : > { %p2092_p7 = scmp.ne.s32.totalorder %s574_s5, %s2091_s16  ;;  %s2096_s26 = sshll.u32 %s2300_s19, 4  ;;  %s2097_s26 = int_to_ptr.vmem [resolvable:$false] %s2096_s26 }
 0x16e   : > { %s2098_s4 = scalar_lea.vmem %s2097_s26, 128  ;;  %p2099_p8 = scmp.lt.s32.totalorder %s574_s5, %s2097_s26 }
 0x16f   : > { %p2094_p13 = pnand %p2092_p7, %p2538_p0  ;;  %p2100_p4 = scmp.lt.s32.totalorder %s2098_s4, %s2091_s16 }
 0x171   : > { %p2095_p5 = pneg %p2094_p13  ;;  %p2101_p11 = por %p2100_p4, %p2099_p8 }
 0x173   : > { %p2102_p3 = pnand %p2101_p11, %p2095_p5 }
 0x175   : > { %2105 = shalt.err (!%p2102_p3)
}
 0x176   : > { %p3195_p9 = scmp.ne.s32.totalorder %s3156_s21, 0  ;;  %s1494_s1 = sshll.u32 %s2708_s6, 1 }
 0x177   : > { %s1495_s2 = sshll.u32 %s2282_s30, 5  ;;  %s3196_s27 = sld [smem:[#allocation54_spill]] }
 0x178   : > { %1656 = dma.hbm_to_vmem [thread:$0]  (!%p3195_p9), %s2842_s8, 64, %s574_s5, %s563_s11  }
 0x179   : > { %s584_s15 = scalar_lea.vmem [#allocation20], %s1494_s1  ;;  %s581_s21 = scalar_lea.sflag [#allocation21], %s2708_s6 }
 0x17a   : > { %s591_s16 = sshll.u32 %s584_s15, 4  ;;  %p3198_p11 = scmp.ne.s32.totalorder %s3183_s17, 0  ;;  %s592_s16 = int_to_ptr.vmem [resolvable:$true] %s591_s16 }
 0x17c   : > { %p3199_p10 = pneg %p3198_p11 }
 0x17d   : > { %s3197_s10 = smov %s3196_s27  ;;  %s2869_s3 = scalar_lea.hbm %s3196_s27, %s1495_s2 }
 0x17e   : > { %s2106_s19 = scalar_lea.hbm %s2869_s3, 32  ;;  %s2111_s11 = scalar_lea.hbm %s3197_s10, 64 }
 0x17f   : > { %p2107_p0 = scmp.ne.s32.totalorder %s2869_s3, %s2106_s19  ;;  %p2112_p2 = scmp.lt.u32.totalorder %s2869_s3, %s3197_s10 }
 0x180   : > { %p2113_p1 = scmp.lt.u32.totalorder %s2111_s11, %s2106_s19  ;;  %p2115_p13 = scmp.lt.u32.totalorder %s2106_s19, %s2869_s3 }
 0x181   : > { %p2109_p6 = pnand %p2107_p0, %p3199_p10 }
 0x182   : > { %p2114_p7 = por %p2113_p1, %p2112_p2 }
 0x183   : > { %p2110_p12 = pneg %p2109_p6 }
 0x184   : > { %p2116_p5 = por %p2115_p13, %p2114_p7 }
 0x186   : > { %p2117_p8 = pnand %p2116_p5, %p2110_p12 }
 0x188   : > { %2120 = shalt.err (!%p2117_p8)
}
 0x189   : > { %s2121_s6 = scalar_lea.vmem %s592_s16, 32  ;;  %p3200_p3 = pmov %p3199_p10 }
 0x18a   : > { %p2122_p4 = scmp.ne.s32.totalorder %s592_s16, %s2121_s6  ;;  %s2301_s1 = smov [#allocation20]  }
 0x18b   : > { %s2126_s2 = sshll.u32 %s2301_s1, 4  ;;  %s2127_s2 = int_to_ptr.vmem [resolvable:$false] %s2126_s2 }
 0x18c   : > { %p2124_p9 = pnand %p2122_p4, %p3200_p3  ;;  %s2128_s22 = scalar_lea.vmem %s2127_s2, 64 }
 0x18d   : > { %p2129_p10 = scmp.lt.s32.totalorder %s592_s16, %s2127_s2  ;;  %p2130_p6 = scmp.lt.s32.totalorder %s2128_s22, %s2121_s6 }
 0x18e   : > { %p2125_p0 = pneg %p2124_p9 }
 0x18f   : > { %p2131_p1 = por %p2130_p6, %p2129_p10 }
 0x191   : > { %p2132_p2 = pnand %p2131_p1, %p2125_p0 }
 0x193   : > { %2135 = shalt.err (!%p2132_p2)
}
 0x194   : > { %1659 = dma.hbm_to_vmem [thread:$0]  (!%p3198_p11), %s2869_s3, 32, %s592_s16, %s581_s21  }
 0x195   : > { %s3201_s9 = sld [smem:[#allocation37_spill]] }
 0x19b   : > { %p3202_p12 = scmp.ne.s32.totalorder %s3201_s9, 0 }
 0x19c   : > { %s2894_s27 = sand.u32 (!%p3202_p12), 1, %s2262_s25   ;;  %p3203_p7 = scmp.ne.s32.totalorder (!%p3202_p12), %s3174_s0, 0 }
 0x19d   : > { %600 = sbr.rel (%p3202_p12) target bundleno = 1989 (0x7c5), region = 68  ;;  %s1497_s15 = sshll.u32 (!%p3202_p12), %s2894_s27, 3 }
 0x19e   : > { %s603_s19 = scalar_lea.sflag (!%p3202_p12), [#allocation3], %s2894_s27  ;;  %s2900_s8 = scalar_lea.vmem (!%p3202_p12), [#allocation2], %s1497_s15 }
 0x1a4   : > { %2209 = dma.done.wait (%p3203_p7), %s603_s19, 128  }
 0x1a5   : > { %2211 = vsyncadd (%p3203_p7), %s603_s19, 4294967168  ;;  %p3204_p11 = scmp.eq.s32.totalorder %s2425_s14, 0 }
 0x1a7   : > { %2213 = dma.done.wait (%p3204_p11), [#allocation6], 32   ;;  %p3205_p13 = pmov %p3204_p11 }
 0x1a8   : > { %s3206_s17 = sld [smem:[#allocation32_spill]]  ;;  %s619_s16 = sand.u32 1, %s2425_s14  }
 0x1a9   : > { %2215 = vsyncadd (%p3205_p13), [#allocation6], 4294967264  ;;  %s3207_s3 = sld [smem:[#allocation36_spill]]  ;;  %s620_s11 = scalar_lea.sflag [#allocation9], %s619_s16 }
 0x1ae   : > { %s2912_s21 = sand.u32 1, %s3206_s17  }
 0x1af   : > { %s2915_s5 = sshll.u32 %s2912_s21, 4  ;;  %p3208_p5 = scmp.ne.s32.totalorder %s3207_s3, 0 }
 0x1b0   : > { %s623_s26 = scalar_lea.vmem [#allocation8], %s2915_s5 }
 0x1b1   : > { %2217 = dma.done.wait (%p3208_p5), %s620_s11, 272  }
 0x1b2   : > { %2219 = vsyncadd (%p3208_p5), %s620_s11, 4294967024  ;;  %s637_s6 = scalar_lea.sflag [#allocation12], %s619_s16  ;;  %s640_s1 = scalar_lea.vmem [#allocation11], %s2915_s5 }
 0x1b3   : > { %2221 = dma.done.wait (%p3208_p5), %s637_s6, 272  }
 0x1b4   : > { %2223 = vsyncadd (%p3208_p5), %s637_s6, 4294967024  ;;  %s648_s2 = scalar_lea.vmem [#allocation13], %s2912_s21  ;;  %s654_s22 = scalar_lea.sflag [#allocation15], %s619_s16 }
 0x1b5   : > { %s657_s9 = scalar_lea.vmem [#allocation14], %s2915_s5 }
 0x1b6   : > { %2225 = dma.done.wait (%p3208_p5), %s654_s22, 272  }
 0x1b7   : > { %2227 = vsyncadd (%p3208_p5), %s654_s22, 4294967024  ;;  %s1503_s19 = sshll.u32 %s2912_s21, 2  ;;  %s671_s11 = scalar_lea.sflag [#allocation18], %s619_s16 }
 0x1b8   : > { %s2936_s4 = scalar_lea.vmem [#allocation17], %s1503_s19 }
 0x1b9   : > { %2229 = dma.done.wait (%p3208_p5), %s671_s11, 64  }
 0x1ba   : > { %2231 = vsyncadd (%p3208_p5), %s671_s11, 4294967232  ;;  %p3209_p8 = pmov %p3204_p11 }
 0x1bc   : > { %2233 = dma.done.wait (%p3209_p8), [#allocation18], 16   ;;  %p3210_p4 = pmov %p3209_p8 }
 0x1bd   : > { %s1505_s6 = sshll.u32 %s2894_s27, 1  ;;  %s684_s22 = scalar_lea.sflag [#allocation21], %s2894_s27 }
 0x1be   : > { %2235 = vsyncadd (%p3210_p4), [#allocation18], 4294967280  ;;  %s2948_s17 = scalar_lea.vmem [#allocation20], %s1505_s6 }
 0x1bf   : > { %2237 = dma.done.wait (%p3203_p7), %s684_s22, 32  }
 0x1c0   : > { %2239 = vsyncadd (%p3203_p7), %s684_s22, 4294967264  ;;  %v768_v0 = vld [vmem:[%s2900_s8] sm:$0xff]  ;;  %s2957_s3 = scalar_lea.vmem [#allocation22], %s1497_s15  ;;  %s3211_s14 = sld [smem:[#allocation34_spill]] }
 0x1c6   : > { %p1507_p3 = scmp.ne.s32.totalorder %s3211_s14, 0 }
 0x1c7   : > { %v1508_v1 = vld [vmem:[#allocation19] ss:$0 sm:$0xff] (!%p1507_p3)  ;;  %vm781_vm0 = vcmask (!%p1507_p3), 261120  }
 0x1c8   : > { %772 = sbr.rel (%p1507_p3) target bundleno = 463 (0x1cf), region = 120  ;;  %v780_v2 = vadd.f32 (!%p1507_p3), %v1508_v1, %v768_v0 }
 0x1ca   : > { %782 = vst.msk [vmem:[%s2957_s3] sm:$0xff] (!%p1507_p3), %vm781_vm0, %v780_v2 }
 0x1cf PF: > { %vm785_vm1 = vcmask 261120   ;;  %v1768_v9 = vld [vmem:[%s623_s26] sm:$0xff]   ;;  %v2302_v11 = vmov 0.0   ;;  %v1770_v12 = vld [vmem:[%s623_s26 + $0x8] sm:$0xff]   ;;  %vm2303_vm2 = vmmov 0   ;;  %vm1018_vm5 = vcmask 64512  }
 0x1d0   : > { %v786_v3 = vsel %vm785_vm1, %v768_v0, 0.0  ;;  %v1769_v10 = vld [vmem:[%s640_s1] sm:$0xff]   ;;  %1548 = vmatprep.subr.bf16.mxu0 %v2302_v11  ;;  %1556 = vmatprep.subr.bf16.mxu1 %v2302_v11  ;;  %v1771_v13 = vld [vmem:[%s640_s1 + $0x8] sm:$0xff]   ;;  %s3212_s0 = scalar_lea.vmem [#allocation10], %s2912_s21  ;;  %s3213_s15 = scalar_lea.vmem [#allocation16], %s2912_s21  ;;  %vm1087_vm6 = vcmask 1043456  }
 0x1d1   : > { %787 = vadd.xlane.f32.xlu0 %v786_v3  ;;  %1549 = vmatpush3.bf16.msra.mxu0 %v1768_v9  ;;  %v1509_v22 = vld [vmem:[#allocation5] ss:$0 sm:$0xff]  ;;  %v1510_v25 = vld [vmem:[#allocation7] ss:$0 sm:$0xff]  ;;  %v1772_v28 = vld [vmem:[%s657_s9] sm:$0xff]   ;;  %v2304_v55 = vmov 0  }
 0x1d2   : > { %1557 = vmatpush3.bf16.msra.mxu1 %v1769_v10  ;;  %1550 = vmatprep.subr.bf16.mxu0 %v2302_v11  ;;  %v1773_v30 = vld [vmem:[%s657_s9 + $0x8] sm:$0xff]   ;;  %s3214_s8 = sld [smem:[#allocation35_spill]]  ;;  %s1196_s21 = sshll.u32 %s2957_s3, 4  ;;  %s3023_s21 = int_to_ptr.vmem [resolvable:$true] %s1196_s21 }
 0x1d3   : > { %1558 = vmatprep.subr.bf16.mxu1 %v2302_v11  ;;  %1552 = vmatprep.mubr.msk.bf16.mxu0 %vm2303_vm2, %v2302_v11  ;;  %v1515_v31 = vld [vmem:[%s648_s2] ss:$0 sm:$0xff]  ;;  %v1015_v54 = vld [vmem:[%s2948_s17] sm:$0x3]  ;;  %s1183_s2 = scalar_lea.sflag [#allocation4], %s2894_s27  ;;  %s2136_s9 = scalar_lea.vmem %s3023_s21, 128 }
 0x1d4   : > { %1560 = vmatprep.mubr.msk.bf16.mxu1 %vm2303_vm2, %v2302_v11  ;;  %v1511_v42 = vld [vmem:[%s3212_s0] ss:$0 sm:$0xff]  ;;  %vm1066_vm7 = vnez %v1015_v54  ;;  %p2137_p9 = scmp.ne.s32.totalorder %s3023_s21, %s2136_s9  ;;  %p3216_p0 = scmp.ne.s32.totalorder %s3178_s18, 0 }
 0x1d5   : > { %1551 = vmatpush3.bf16.msra.mxu0 %v1770_v12  ;;  %v1519_v44 = vld [vmem:[%s3213_s15] ss:$0 sm:$0xff]  ;;  %v1067_v56 = vsel %vm1066_vm7, 16843009, %v2304_v55  ;;  %s2305_s19 = smov [#allocation22]  }
 0x1d6   : > { %1559 = vmatpush3.bf16.msra.mxu1 %v1771_v13  ;;  %1564 = vmatprep.subr.bf16.mxu0 %v2302_v11  ;;  %v1068_v57 = vunpack.c.0.s8 %v1067_v56  ;;  %p2138_p10 = pnand %p2137_p9, %p3216_p0  ;;  %s2140_s17 = sshll.u32 %s2305_s19, 4  ;;  %s2141_s17 = int_to_ptr.vmem [resolvable:$false] %s2140_s17 }
 0x1d7   : > { %1572 = vmatprep.subr.bf16.mxu1 %v2302_v11  ;;  %s2142_s11 = scalar_lea.vmem %s2141_s17, 256  ;;  %p2143_p1 = scmp.lt.s32.totalorder %s3023_s21, %s2141_s17 }
 0x1d8   : > { %vm1069_vm8 = vcmp.ne.s32.totalorder %v1068_v57, 0  ;;  %s1527_s16 = sshll.u32 %s3214_s8, 7  ;;  %p2139_p6 = pneg %p2138_p10 }
 0x1d9   : > { %p2144_p2 = scmp.lt.s32.totalorder %s2142_s11, %s2136_s9 }
 0x1db   : > { %p2145_p12 = por %p2144_p2, %p2143_p1 }
 0x1dd   : > { %p2146_p7 = pnand %p2145_p12, %p2139_p6 }
 0x25e   : > { %v788_v4 = vpop.xlane.xlu0 %787 }
 0x25f   : > { %v790_v5 = vmul.f32 0.03125, %v788_v4 }
 0x261   : > { %v791_v6 = vsub.f32 %v768_v0, %v790_v5 }
 0x263   : > { %v792_v7 = vmul.f32 %v791_v6, %v791_v6  ;;  %v813_v23 = vmul.f32 %v1509_v22, %v791_v6  ;;  %v1132_v6 = vld [vmem:[%s2936_s4] sm:$0xf]  ;;  %s3215_s4 = sld [smem:[#allocation55_spill]] }
 0x265   : > { %v793_v8 = vsel %vm785_vm1, %v792_v7, 0.0  ;;  %v1138_v7 = vsel %vm1087_vm6, %v1132_v6, 0 }
 0x266   : > { %794 = vadd.xlane.f32.xlu0 %v793_v8 }
 0x269   : > { %s3021_s1 = scalar_lea.hbm %s3215_s4, %s1527_s16 }
 0x2f3   : > { %v795_v14 = vpop.xlane.xlu0 %794 }
 0x2f4   : > { %v797_v15 = vmul.f32 0.032258064, %v795_v14 }
 0x2f6   : > { %1774 = vrsqrt.f32 %v797_v15  ;;  %vm800_vm3 = vcmp.eq.f32.partialorder %v797_v15, inf  ;;  %v803_v18 = vand.u32 2147483648, %v797_v15  ;;  %vm802_vm4 = vcmp.eq.f32.partialorder %v797_v15, 0.0 }
 0x300   : > { %v1775_v16 = vpop.eup %1774 }
 0x301   : > { %v799_v17 = vmul.f32 %v1775_v16, %v797_v15 }
 0x303   : > { %v801_v19 = vsel %vm800_vm3, %v797_v15, %v799_v17  ;;  %v1131_v17 = vld [vmem:[%s2957_s3] sm:$0xff] }
 0x304   : > { %v804_v20 = vsel %vm802_vm4, %v803_v18, %v801_v19 }
 0x305   : > { %v805_v21 = vadd.f32 1e-06, %v804_v20 }
 0x307   : > { %1776 = vrcp.f32 %v805_v21 }
 0x311   : > { %v1777_v24 = vpop.eup %1776 }
 0x312   : > { %v814_v26 = vmul.f32 %v1777_v24, %v813_v23 }
 0x314   : > { %v821_v27 = vadd.f32 %v1510_v25, %v814_v26 }
 0x316   : > { %v826_v29 = vpack.c.bf16 %v821_v27, %v821_v27 }
 0x318   : > { %1553 = vmatmul.mubr.msk.bf16.vlgmr.msra.gmra.mrb[0].mxu0 %vm785_vm1, %v826_v29  ;;  %1561 = vmatmul.mubr.msk.bf16.vlgmr.msra.gmra.mrb[0].mxu1 %vm785_vm1, %v826_v29 }
 0x319   : > { %1565 = vmatpush3.bf16.msra.mxu0 %v1772_v28  ;;  %1568 = vmatprep.mubr.msk.bf16.mxu0 %vm2303_vm2, %v2302_v11 }
 0x31a   : > { %1566 = vmatprep.subr.bf16.mxu0 %v2302_v11  ;;  %1574 = vmatprep.mubr.msk.bf16.mxu1 %vm2303_vm2, %v2302_v11 }
 0x31d   : > { %1567 = vmatpush3.bf16.msra.mxu0 %v1773_v30 }
 0x31e   : > { %1578 = vmatprep.subr.bf16.mxu0 %v2302_v11 }
 0x320   : > { %1569 = vmatmul.mubr.msk.bf16.vlgmr.msra.gmra.mrb[4].mxu0 %vm785_vm1, %v826_v29 }
 0x321   : > { %1580 = vmatprep.mubr.msk.bf16.mxu0 %vm2303_vm2, %v2302_v11 }
 0x3eb   : > { %v883_v32 = vpop.f32.mrb[0].mxu0  ;;  %v946_v33 = vpop.f32.mrb[0].mxu1 }
 0x3ec   : > { %v947_v34 = vadd.f32 %v1515_v31, %v946_v33  ;;  %v1554_v35 = vpop.f32.mrb[1].mxu0  ;;  %v1562_v36 = vpop.f32.mrb[1].mxu1  ;;  %v884_v45 = vadd.f32 %v1511_v42, %v883_v32 }
 0x3ed   : > { %v886_v37 = vpop.f32.mrb[2].mxu0  ;;  %v949_v38 = vpop.f32.mrb[2].mxu1 }
 0x3ee   : > { %v1017_v39 = vpack.c.bf16 %v947_v34, %v947_v34  ;;  %v1555_v40 = vpop.f32.mrb[3].mxu0  ;;  %v1563_v41 = vpop.f32.mrb[3].mxu1  ;;  %v1016_v50 = vpack.c.bf16 %v884_v45, %v884_v45 }
 0x3f0   : > { %v1023_v43 = vsel %vm1018_vm5, %v1017_v39, 0 }
 0x3f1   : > { %1573 = vmatpush3.bf16.xpose.msra.mxu1 %v1023_v43 }
 0x3f2   : > { %1584 = vmatprep.subr.bf16.mxu1 %v2302_v11 }
 0x3f3   : > { %v1009_v46 = vpop.f32.mrb[4].mxu0 }
 0x3f4   : > { %v1010_v47 = vadd.f32 %v1519_v44, %v1009_v46  ;;  %v1570_v48 = vpop.f32.mrb[5].mxu0 }
 0x3f5   : > { %v1012_v49 = vpop.f32.mrb[6].mxu0 }
 0x3f6   : > { %v1083_v51 = vpack.c.bf16 %v1010_v47, %v1010_v47  ;;  %v1571_v52 = vpop.f32.mrb[7].mxu0 }
 0x3f8   : > { %v1089_v53 = vsel %vm1087_vm6, %v1083_v51, 0  ;;  %1575 = vmatmul.mubr.msk.bf16.vlgmr.msra.gmra.mrb[4].mxu1 %vm1018_vm5, %v1016_v50 }
 0x3f9   : > { %1579 = vmatpush3.bf16.msra.mxu0 %v1089_v53  ;;  %1586 = vmatprep.mubr.msk.bf16.mxu1 %vm2303_vm2, %v2302_v11 }
 0x3fa   : > { %1585 = vmatpush3.bf16.msra.mxu1 %v1138_v7 }
 0x4cb   : > { %v1059_v58 = vpop.f32.mrb[4].mxu1 }
 0x4cc   : > { %v1065_v59 = vmul.f32 0.35355338, %v1059_v58  ;;  %v1576_v60 = vpop.f32.mrb[5].mxu1 }
 0x4cd   : > { %v1062_v61 = vpop.f32.mrb[6].mxu1 }
 0x4ce   : > { %v1577_v62 = vpop.f32.mrb[7].mxu1  ;;  %v1070_v63 = vsel %vm1069_vm8, %v1065_v59, -1e+09 }
 0x4cf   : > { %v1071_v0 = vsel %vm1018_vm5, %v1070_v63, -inf }
 0x4d0   : > { %1072 = vmax.xlane.f32.xlu1 %v1071_v0 }
 0x55d   : > { %v1073_v1 = vpop.xlane.xlu1 %1072 }
 0x55e   : > { %v1074_v2 = vsub.f32 %v1070_v63, %v1073_v1 }
 0x560   : > { %v1075_v3 = vmul.f32 1.442695, %v1074_v2 }
 0x562   : > { %1778 = vpow2.f32 %v1075_v3 }
 0x56c   : > { %v1779_v4 = vpop.eup %1778 }
 0x56d   : > { %v1077_v5 = vsel %vm1018_vm5, %v1779_v4, 0.0 }
 0x56e   : > { %1078 = vadd.xlane.f32.xlu1 %v1077_v5 }
 0x5fb   : > { %v1079_v8 = vpop.xlane.xlu1 %1078 }
 0x5fc   : > { %1780 = vrcp.f32 %v1079_v8 }
 0x606   : > { %v1781_v9 = vpop.eup %1780 }
 0x607   : > { %v1081_v10 = vmul.f32 %v1781_v9, %v1779_v4 }
 0x609   : > { %v1082_v11 = vpack.c.bf16 %v1081_v10, %v1081_v10 }
 0x60b   : > { %1581 = vmatmul.mubr.msk.bf16.vlgmr.msra.gmra.mrb[8].mxu0 %vm1018_vm5, %v1082_v11 }
 0x6de   : > { %v1125_v12 = vpop.f32.mrb[8].mxu0 }
 0x6df   : > { %v1133_v13 = vpack.c.bf16 %v1125_v12, %v1125_v12  ;;  %v1582_v14 = vpop.f32.mrb[9].mxu0 }
 0x6e0   : > { %v1128_v15 = vpop.f32.mrb[10].mxu0 }
 0x6e1   : > { %v1583_v16 = vpop.f32.mrb[11].mxu0  ;;  %1587 = vmatmul.mubr.msk.bf16.vlgmr.msra.gmra.mrb[8].mxu1 %vm1018_vm5, %v1133_v13 }
 0x7b4   : > { %v1174_v18 = vpop.f32.mrb[8].mxu1 }
 0x7b5   : > { %v1180_v19 = vadd.f32 %v1174_v18, %v1131_v17  ;;  %v1588_v20 = vpop.f32.mrb[9].mxu1 }
 0x7b6   : > { %v1177_v21 = vpop.f32.mrb[10].mxu1 }
 0x7b7   : > { %1181 = vst.msk [vmem:[%s2957_s3] sm:$0xff] %vm785_vm1, %v1180_v19  ;;  %v1589_v22 = vpop.f32.mrb[11].mxu1 }
 0x7b8   : > { %2149 = shalt.err (!%p2146_p7)
}
 0x7b9   : > { %s2150_s27 = scalar_lea.hbm %s3021_s1, 128  ;;  %s2154_s3 = scalar_lea.hbm %s3215_s4, 256 }
 0x7ba   : > { %p2151_p11 = scmp.ne.s32.totalorder %s3021_s1, %s2150_s27  ;;  %p2155_p8 = scmp.lt.u32.totalorder %s3021_s1, %s3215_s4 }
 0x7bb   : > { %p2156_p4 = scmp.lt.u32.totalorder %s2154_s3, %s2150_s27  ;;  %p2158_p9 = scmp.lt.u32.totalorder %s2150_s27, %s3021_s1 }
 0x7bc   : > { %p2152_p13 = pnand %p2151_p11, %p3216_p0 }
 0x7bd   : > { %p2157_p3 = por %p2156_p4, %p2155_p8 }
 0x7be   : > { %p2153_p5 = pneg %p2152_p13 }
 0x7bf   : > { %p2159_p10 = por %p2158_p9, %p2157_p3 }
 0x7c1   : > { %p2160_p6 = pnand %p2159_p10, %p2153_p5 }
 0x7c3   : > { %2163 = shalt.err (!%p2160_p6)
}
 0x7c4   : > { %1620 = dma.vmem_to_hbm [thread:$0]  (%p3216_p0), %s3023_s21, 128, %s3021_s1, %s1183_s2  }
 0x7c5 PF: > { %p1671_p1 = scmp.ge.s32.totalorder %s2286_s13, 2  ;;  %s1208_s15 = sand.u32 1, %s2258_s24  }
 0x7c6   : > { %p3217_p2 = scmp.ne.s32.totalorder %s3180_s28, 0  ;;  %s1209_s8 = scalar_lea.sflag [#allocation4], %s1208_s15 }
 0x7c8   : > { %p1661_p12 = pnand %p1671_p1, %p3217_p2 }
 0x7ca   : > { %2241 = dma.done.wait (!%p1661_p12), %s1209_s8, 128  }
 0x7cb   : > { %2243 = vsyncadd (!%p1661_p12), %s1209_s8, 4294967168  ;;  %s44_s13 = sadd.s32 1, %s2286_s13   ;;  %s3218_s21 = sld [smem:[#allocation32_spill]] }
 0x7cc   : > { %p41_p7 = scmp.ge.s32.totalorder %s44_s13, 10   ;;  %s3219_s18 = sld [smem:[#allocation41_spill]] }
 0x7cd   : > { %s3220_s16 = sld [smem:[#allocation33_spill]]  ;;  %s3221_s26 = sld [smem:[#allocation42_spill]] }
 0x7ce   : > { %s3222_s5 = sld [smem:[#allocation39_spill]]  ;;  %s3223_s1 = sld [smem:[#allocation40_spill]] }
 0x7cf   : > { %s3224_s22 = smov %s2254_s23  ;;  %s3226_s24 = smov %s2262_s25 }
 0x7d0   : > { %s3228_s27 = smov %s2278_s29  ;;  %s3229_s28 = smov %s2282_s30 }
 0x7d1   :  { %43 = sbr.rel (!%p41_p7) target bundleno = 34 (0x22), region = 227 }
 0x7d2   : > { %s3225_s23 = smov %s3219_s18 }
 0x7d3   : > { %s3227_s25 = smov %s3220_s16 }
 0x7d4   : > { %s3230_s29 = smov %s3222_s5  ;;  %s3231_s30 = smov %s3223_s1 }
 0x7d8   :  { %1214 = vsyncpa [#allocation3], 1 }
 0x7d9   :  { %1216 = vsyncpa [#allocation3 + $0x1], 1 }
 0x7da   :  { %1217 = vsyncpa [#allocation6], 1 }
 0x7db   :  { %1218 = vsyncpa [#allocation9], 1 }
 0x7dc   :  { %1220 = vsyncpa [#allocation9 + $0x1], 1 }
 0x7dd   :  { %1221 = vsyncpa [#allocation12], 1 }
 0x7de   :  { %1223 = vsyncpa [#allocation12 + $0x1], 1 }
 0x7df   :  { %1224 = vsyncpa [#allocation15], 1 }
 0x7e0   :  { %1226 = vsyncpa [#allocation15 + $0x1], 1 }
 0x7e1   :  { %1227 = vsyncpa [#allocation18], 1 }
 0x7e2   :  { %1229 = vsyncpa [#allocation18 + $0x1], 1 }
 0x7e3   :  { %1230 = vsyncpa [#allocation21], 1 }
 0x7e4   :  { %1232 = vsyncpa [#allocation21 + $0x1], 1 }
 0x7e5   :  { %1233 = vsyncpa [#allocation4], 1 }
 0x7e6   :  { %1235 = vsyncpa [#allocation4 + $0x1], 1 }

</bundles_post_ra>
